<compile_context>
chip_gen: v7x
topology: tpu7x:2x2x1
jax: 0.10.0
libtpu: 0.0.40
codegen_flags: <defaults>
</compile_context>

<pallas_src>
import functools

import jax
import jax.numpy as jnp
from jax.experimental import pallas as pl
from jax.experimental.pallas import tpu as pltpu

N_EMBD = 384
HIDDEN = 4 * N_EMBD


def _ffn_kernel(x_ref, w1_ref, b1_ref, w2_ref, b2_ref, o_ref):
    # x_ref: (tm, C) f32 | w1_ref: (C, H) bf16 | b1_ref: (1, H) f32
    # w2_ref: (H, C) bf16 | b2_ref: (1, C) f32 | o_ref: (tm, C) f32
    x = x_ref[...].astype(jnp.bfloat16)                     # bf16 MXU inputs
    h = jnp.dot(x, w1_ref[...], preferred_element_type=jnp.float32)
    h = jnp.maximum(h + b1_ref[...], 0.0)                   # bias + ReLU in f32
    y = jnp.dot(h.astype(jnp.bfloat16), w2_ref[...],
                preferred_element_type=jnp.float32) + b2_ref[...]
    o_ref[...] = y.astype(o_ref.dtype)                      # Dropout(eval) == identity


def _round_up(x, m):
    return ((x + m - 1) // m) * m


def _cdiv(a, b):
    return (a + b - 1) // b


def _tile_config():
    """Generation-aware (tm_max, vmem_limit_bytes). Conservative on unknown HW."""
    try:
        kind = jax.devices()[0].device_kind.lower()
    except Exception:  # pragma: no cover - defensive only
        kind = ""
    if ("v5" in kind) or ("v6" in kind):
        # 128 MiB physical VMEM: tm=2048 footprint ~35-40 MiB fits comfortably.
        return 2048, 48 * 1024 * 1024
    # v7x (64 MiB VMEM per TC) or unknown: tm=1024 keeps ~45% headroom.
    return 1024, 40 * 1024 * 1024


@functools.partial(jax.jit, static_argnames=("tm",))
def feed_forward(x, w1, b1, w2, b2, *, tm=None):
    """x: (B, T, C) -> (B, T, C). Weights in nn.Linear (in, out) layout."""
    B, T, C = x.shape
    H = w1.shape[1]
    M = B * T

    tm_max, vmem_limit = _tile_config()
    if tm is not None:
        tm_max = tm                         # caller-provided cap (static)

    # Pad-balanced tiling: pick the step count first, then the smallest
    # 8-aligned tile that covers M, so padding waste is < 8*grid_m rows.
    grid_m = max(1, _cdiv(M, tm_max))
    if M >= 16:
        grid_m = max(grid_m, 2)             # let v7x shard rows across its 2 TCs
    tm_eff = _round_up(_cdiv(M, grid_m), 8)
    m_pad = grid_m * tm_eff

    x2 = x.reshape(M, C)
    if m_pad != M:
        x2 = jnp.pad(x2, ((0, m_pad - M), (0, 0)))

    # bf16 weights: 2-4x MXU throughput and half the weight DMA / VMEM footprint.
    w1b = w1.astype(jnp.bfloat16)
    w2b = w2.astype(jnp.bfloat16)
    b1f = b1.reshape(1, H).astype(jnp.float32)
    b2f = b2.reshape(1, C).astype(jnp.float32)

    cost = pl.CostEstimate(
        flops=4 * m_pad * C * H,                             # two matmuls
        transcendentals=0,
        bytes_accessed=(m_pad * C * x.dtype.itemsize         # x in
                        + m_pad * C * x.dtype.itemsize       # out
                        + 2 * C * H * 2                      # bf16 weights
                        + (H + C) * 4),                      # biases
    )

    out2 = pl.pallas_call(
        _ffn_kernel,
        out_shape=jax.ShapeDtypeStruct((m_pad, C), x.dtype),
        grid_spec=pltpu.PrefetchScalarGridSpec(
            num_scalar_prefetch=0,
            grid=(grid_m,),
            in_specs=[
                pl.BlockSpec((tm_eff, C), lambda i: (i, 0)),  # x rows (pipelined)
                pl.BlockSpec((C, H), lambda i: (0, 0)),       # W1 (resident)
                pl.BlockSpec((1, H), lambda i: (0, 0)),       # b1
                pl.BlockSpec((H, C), lambda i: (0, 0)),       # W2 (resident)
                pl.BlockSpec((1, C), lambda i: (0, 0)),       # b2
            ],
            out_specs=pl.BlockSpec((tm_eff, C), lambda i: (i, 0)),
        ),
        compiler_params=pltpu.CompilerParams(
            dimension_semantics=("parallel",),                # shard rows across TCs
            vmem_limit_bytes=vmem_limit,
        ),
        cost_estimate=cost,
    )(x2, w1b, b1f, w2b, b2f)

    if m_pad != M:
        out2 = out2[:M]
    return out2.reshape(B, T, C)


def _init_params(key, n_embd):
    # Deterministic init mimicking nn.Linear's U(-1/sqrt(fan_in), 1/sqrt(fan_in)).
    k1, k2, k3, k4 = jax.random.split(key, 4)
    hid = 4 * n_embd
    lim1 = 1.0 / jnp.sqrt(jnp.float32(n_embd))
    lim2 = 1.0 / jnp.sqrt(jnp.float32(hid))
    w1 = jax.random.uniform(k1, (n_embd, hid), jnp.float32, -lim1, lim1)
    b1 = jax.random.uniform(k2, (hid,), jnp.float32, -lim1, lim1)
    w2 = jax.random.uniform(k3, (hid, n_embd), jnp.float32, -lim2, lim2)
    b2 = jax.random.uniform(k4, (n_embd,), jnp.float32, -lim2, lim2)
    return w1, b1, w2, b2


def _ref_ffn(x, w1, b1, w2, b2):
    B, T, C = x.shape
    h = jnp.maximum(x.reshape(-1, C) @ w1 + b1, 0.0)
    return (h @ w2 + b2).reshape(B, T, C)


if __name__ == "__main__":
    key = jax.random.PRNGKey(0)
    kx, kp = jax.random.split(key)

    w1, b1, w2, b2 = _init_params(kp, N_EMBD)

    # Small shape consistent with the module (B=2, T=8, C=384).
    B, T = 2, 8
    x = jax.random.normal(kx, (B, T, N_EMBD), jnp.float32)

    out = jax.block_until_ready(feed_forward(x, w1, b1, w2, b2))
    ref = _ref_ffn(x, w1, b1, w2, b2)
    assert out.shape == (B, T, N_EMBD)
    # bf16 MXU inputs w/ f32 accumulation -> loosened tolerance vs f32 reference.
    assert jnp.allclose(out, ref, atol=5e-2, rtol=5e-2)

    # Explicit small tile -> multi-step grid path.
    out_g = jax.block_until_ready(feed_forward(x, w1, b1, w2, b2, tm=8))
    assert jnp.allclose(out_g, ref, atol=5e-2, rtol=5e-2)

    # Ragged row count (M = 21, not a multiple of 8) -> balanced pad + slice path.
    xr = jax.random.normal(kx, (3, 7, N_EMBD), jnp.float32)
    out_r = jax.block_until_ready(feed_forward(xr, w1, b1, w2, b2))
    ref_r = _ref_ffn(xr, w1, b1, w2, b2)
    assert jnp.allclose(out_r, ref_r, atol=5e-2, rtol=5e-2)

    print("KERNEL_OK")
</pallas_src>

<mosaic_0001>
module attributes {stable_mosaic.version = 11 : i64} {
  func.func @_ffn_kernel(%arg0: i32, %arg1: memref<8x384xf32, #tpu.memory_space<vmem>>, %arg2: memref<384x1536xbf16, #tpu.memory_space<vmem>>, %arg3: memref<1x1536xf32, #tpu.memory_space<vmem>>, %arg4: memref<1536x384xbf16, #tpu.memory_space<vmem>>, %arg5: memref<1x384xf32, #tpu.memory_space<vmem>>, %arg6: memref<8x384xf32, #tpu.memory_space<vmem>>) attributes {dimension_semantics = [#tpu.dimension_semantics<parallel>], iteration_bounds = array<i64: 2>, scalar_prefetch = 0 : i64, scratch_operands = 0 : i64, tpu.core_type = #tpu.core_type<tc>, window_params = [{transform_indices = @transform_0, window_bounds = array<i64: 8, 384>}, {pipeline_mode = #tpu.pipeline_mode<synchronous>, transform_indices = @transform_1, window_bounds = array<i64: 384, 1536>}, {pipeline_mode = #tpu.pipeline_mode<synchronous>, transform_indices = @transform_2, window_bounds = array<i64: 1, 1536>}, {pipeline_mode = #tpu.pipeline_mode<synchronous>, transform_indices = @transform_3, window_bounds = array<i64: 1536, 384>}, {pipeline_mode = #tpu.pipeline_mode<synchronous>, transform_indices = @transform_4, window_bounds = array<i64: 1, 384>}, {transform_indices = @transform_5, window_bounds = array<i64: 8, 384>}]} {
    %c0 = arith.constant 0 : index
    %c0_0 = arith.constant 0 : index
    %0 = vector.load %arg1[%c0, %c0_0] : memref<8x384xf32, #tpu.memory_space<vmem>>, vector<8x384xf32>
    %1 = arith.truncf %0 : vector<8x384xf32> to vector<8x384xbf16>
    %c0_1 = arith.constant 0 : index
    %c0_2 = arith.constant 0 : index
    %2 = vector.load %arg2[%c0_1, %c0_2] : memref<384x1536xbf16, #tpu.memory_space<vmem>>, vector<384x1536xbf16>
    %cst = arith.constant dense<0.000000e+00> : vector<8x1536xf32>
    %3 = tpu.matmul %1, %2, %cst {dimension_numbers = #tpu.dot_dimension_numbers<[1], [0], [0], [1], [0, 0, 1, 1], [], []>} : vector<8x384xbf16>, vector<384x1536xbf16>, vector<8x1536xf32> -> vector<8x1536xf32>
    %c0_3 = arith.constant 0 : index
    %c0_4 = arith.constant 0 : index
    %4 = vector.load %arg3[%c0_3, %c0_4] : memref<1x1536xf32, #tpu.memory_space<vmem>>, vector<1x1536xf32>
    %5 = vector.broadcast %4 : vector<1x1536xf32> to vector<8x1536xf32>
    %6 = arith.addf %3, %5 : vector<8x1536xf32>
    %cst_5 = arith.constant 0.000000e+00 : f32
    %7 = vector.broadcast %cst_5 : f32 to vector<8x1536xf32>
    %8 = arith.maximumf %6, %7 : vector<8x1536xf32>
    %9 = arith.truncf %8 : vector<8x1536xf32> to vector<8x1536xbf16>
    %c0_6 = arith.constant 0 : index
    %c0_7 = arith.constant 0 : index
    %10 = vector.load %arg4[%c0_6, %c0_7] : memref<1536x384xbf16, #tpu.memory_space<vmem>>, vector<1536x384xbf16>
    %cst_8 = arith.constant dense<0.000000e+00> : vector<8x384xf32>
    %11 = tpu.matmul %9, %10, %cst_8 {dimension_numbers = #tpu.dot_dimension_numbers<[1], [0], [0], [1], [0, 0, 1, 1], [], []>} : vector<8x1536xbf16>, vector<1536x384xbf16>, vector<8x384xf32> -> vector<8x384xf32>
    %c0_9 = arith.constant 0 : index
    %c0_10 = arith.constant 0 : index
    %12 = vector.load %arg5[%c0_9, %c0_10] : memref<1x384xf32, #tpu.memory_space<vmem>>, vector<1x384xf32>
    %13 = vector.broadcast %12 : vector<1x384xf32> to vector<8x384xf32>
    %14 = arith.addf %11, %13 : vector<8x384xf32>
    %c0_11 = arith.constant 0 : index
    %c0_12 = arith.constant 0 : index
    %15 = vector.load %arg6[%c0_11, %c0_12] : memref<8x384xf32, #tpu.memory_space<vmem>>, vector<8x384xf32>
    tpu.vector_store %arg6[%c0_11, %c0_12], %14 {strides = array<i32>} : memref<8x384xf32, #tpu.memory_space<vmem>>, vector<8x384xf32>,
    return
  }
  func.func @transform_0(%arg0: i32) -> (i32, i32) {
    %c0_i32 = arith.constant 0 : i32
    %c0_i32_0 = arith.constant 0 : i32
    return %arg0, %c0_i32 : i32, i32
  }
  func.func @transform_1(%arg0: i32) -> (i32, i32) {
    %c0_i32 = arith.constant 0 : i32
    %c0_i32_0 = arith.constant 0 : i32
    %c0_i32_1 = arith.constant 0 : i32
    return %c0_i32, %c0_i32_0 : i32, i32
  }
  func.func @transform_2(%arg0: i32) -> (i32, i32) {
    %c0_i32 = arith.constant 0 : i32
    %c0_i32_0 = arith.constant 0 : i32
    %c0_i32_1 = arith.constant 0 : i32
    return %c0_i32, %c0_i32_0 : i32, i32
  }
  func.func @transform_3(%arg0: i32) -> (i32, i32) {
    %c0_i32 = arith.constant 0 : i32
    %c0_i32_0 = arith.constant 0 : i32
    %c0_i32_1 = arith.constant 0 : i32
    return %c0_i32, %c0_i32_0 : i32, i32
  }
  func.func @transform_4(%arg0: i32) -> (i32, i32) {
    %c0_i32 = arith.constant 0 : i32
    %c0_i32_0 = arith.constant 0 : i32
    %c0_i32_1 = arith.constant 0 : i32
    return %c0_i32, %c0_i32_0 : i32, i32
  }
  func.func @transform_5(%arg0: i32) -> (i32, i32) {
    %c0_i32 = arith.constant 0 : i32
    %c0_i32_0 = arith.constant 0 : i32
    return %arg0, %c0_i32 : i32, i32
  }
}

</mosaic_0001>

<bundles_post_ra>
// kernel: feed_forward.1
= control target key start
LH: loop header
LB: loop body
LE: loop exit
PB: predicated region body
PF: predicated region fallthrough
CT: control target
= control target key end

     0   :  { %10 = vsyncpa [#allocation3], 0  ;;  %s8730_s0 = inlined_call_operand.vmem [shape: f32[16,384], index: 0, kind: input, shape index: {}]   ;;  %s8731_s1 = inlined_call_operand.vmem [shape: bf16[384,1536], index: 1, kind: input, shape index: {}]   ;;  %s8732_s2 = inlined_call_operand.vmem [shape: f32[1,1536], index: 2, kind: input, shape index: {}]   ;;  %s8733_s3 = inlined_call_operand.vmem [shape: bf16[1536,384], index: 3, kind: input, shape index: {}]   ;;  %s8734_s4 = inlined_call_operand.vmem [shape: f32[1,384], index: 4, kind: input, shape index: {}]   ;;  %s8735_s5 = inlined_call_operand.hbm [shape: f32[16,384], index: 5, kind: output, shape index: {}]  }
   0x1   :  { %12 = vsyncpa [#allocation3 + $0x1], 0  ;;  %s6768_s18 = smov 0   ;;  %s6770_s19 = smov 0  }
   0x2   :  { %s6772_s20 = smov 0   ;;  %s6774_s21 = smov 0  }
   0x3 LB: > { %s6789_s22 = sadd.s32 4294967295, %s6734_s21   ;;  %s5038_s23 = sadd.s32 4294967294, %s6734_s21   ;;  %s6734_s21 = sphi %s6774_s21, %s8741_s21   ;;  %s6730_s20 = sphi %s6772_s20, %s8740_s20   ;;  %s6726_s19 = sphi %s6770_s19, %s8739_s19   ;;  %s6722_s18 = sphi %s6768_s18, %s8738_s18  }
   0x4   : > { %s6793_s24 = sadd.s32 1, %s6734_s21   ;;  %s135_s25 = sadd.s32 1, %s6730_s20 }
   0x5   : > { %s132_s26 = ssub.s32 %s6734_s21, %s6793_s24  ;;  %p145_p0 = scmp.ne.s32.totalorder %s6730_s20, %s6726_s19 }
   0x6   : > { %p133_p1 = scmp.eq.s32.totalorder %s132_s26, 0  ;;  %p146_p2 = scmp.eq.s32.totalorder %s6789_s22, 1 }
   0x7   : > { %p151_p3 = scmp.ne.s32.totalorder %s6726_s19, %s6722_s18  ;;  %p152_p4 = scmp.eq.s32.totalorder %s5038_s23, 1 }
   0x8   : > { %s6804_s27 = scalar_select %p133_p1, %s6730_s20, %s135_s25  }
   0x9   : > { %p6806_p5 = por %p146_p2, %p145_p0  ;;  %p6810_p6 = por %p152_p4, %p151_p3 }
   0xa   : > { %p5041_p7 = scmp.ge.s32.totalorder %s6734_s21, 1  ;;  %p190_p8 = scmp.lt.s32.totalorder %s6734_s21, 3 }
   0xc   : > { %p191_p9 = pnand %p5041_p7, %p190_p8 }
   0xd   : > { %v5855_v0 = vld [vmem:[%s8731_s1 + $0x4] ss:$48 sps:$4 sm:$0xff] (!%p191_p9)   ;;  %v5857_v1 = vld [vmem:[%s8731_s1] ss:$48 sps:$4 sm:$0xff] (!%p191_p9)   ;;  %p218_p10 = scmp.lt.s32.totalorder (!%p191_p9), %s6789_s22, 1  ;;  %s215_s11 = sand.u32 (!%p191_p9), 1, %s6726_s19  }
   0xe   : > { %194 = sbr.rel (%p191_p9) target bundleno = 911 (0x38f), region = 40  ;;  %2022 = vmatprep.subr.bf16.mxu1 (!%p191_p9), %v5855_v0  ;;  %v5858_v2 = vld [vmem:[%s8731_s1 + $0x64] ss:$48 sps:$4 sm:$0xff] (!%p191_p9)   ;;  %v5860_v3 = vld [vmem:[%s8731_s1 + $0x60] ss:$48 sps:$4 sm:$0xff] (!%p191_p9)  }
   0xf   : > { %2023 = vmatpush1.bf16.msra.mxu1 (!%p191_p9), %v5857_v1  ;;  %v5861_v4 = vld [vmem:[%s8731_s1 + $0xc4] ss:$48 sps:$4 sm:$0xff] (!%p191_p9)   ;;  %v5863_v5 = vld [vmem:[%s8731_s1 + $0xc0] ss:$48 sps:$4 sm:$0xff] (!%p191_p9)   ;;  %v6736_v1 = vmov (!%p191_p9), 0   ;;  %s5812_s13 = smul.u32 (!%p191_p9), 24, %s215_s11 }
  0x10   : > { %2024 = vmatprep.subr.bf16.mxu1 (!%p191_p9), %v5858_v2  ;;  %v5864_v6 = vld [vmem:[%s8731_s1 + $0x124] ss:$48 sps:$4 sm:$0xff] (!%p191_p9)   ;;  %v5866_v7 = vld [vmem:[%s8731_s1 + $0x120] ss:$48 sps:$4 sm:$0xff] (!%p191_p9)   ;;  %s5814_s15 = smul.u32 (!%p191_p9), 384, %s6789_s22 }
  0x11   : > { %v5867_v8 = vld [vmem:[%s8731_s1 + $0x184] ss:$48 sps:$4 sm:$0xff] (!%p191_p9)   ;;  %v5869_v9 = vld [vmem:[%s8731_s1 + $0x180] ss:$48 sps:$4 sm:$0xff] (!%p191_p9)   ;;  %s217_s14 = scalar_lea.vmem (!%p191_p9), [#allocation2], %s5812_s13 }
  0x12   : > { %v5870_v10 = vld [vmem:[%s8731_s1 + $0x1e4] ss:$48 sps:$4 sm:$0xff] (!%p191_p9)   ;;  %v5872_v11 = vld [vmem:[%s8731_s1 + $0x1e0] ss:$48 sps:$4 sm:$0xff] (!%p191_p9)   ;;  %s4979_s16 = sshll.u32 (!%p191_p9), %s217_s14, 4  ;;  %s8688_s23 = scalar_lea.hbm (!%p191_p9), %s8735_s5, %s5814_s15  ;;  %s8690_s16 = int_to_ptr.vmem [resolvable:$true] %s4979_s16 }
  0x13   : > { %2025 = vmatpush1.bf16.msra.mxu1 (!%p191_p9), %v5860_v3  ;;  %v5873_v12 = vld [vmem:[%s8731_s1 + $0x244] ss:$48 sps:$4 sm:$0xff] (!%p191_p9)   ;;  %v5902_v14 = vld [vmem:[%s8731_s1 + $0x10] ss:$48 sps:$4 sm:$0xff] (!%p191_p9)   ;;  %s6672_s25 = scalar_lea.vmem (!%p191_p9), %s8690_s16, 384 }
  0x14   : > { %2026 = vmatprep.subr.bf16.mxu1 (!%p191_p9), %v5861_v4  ;;  %v5900_v13 = vld [vmem:[%s8731_s1 + $0x14] ss:$48 sps:$4 sm:$0xff] (!%p191_p9)   ;;  %v5875_v15 = vld [vmem:[%s8731_s1 + $0x240] ss:$48 sps:$4 sm:$0xff] (!%p191_p9)   ;;  %p6673_p11 = scmp.ne.s32.totalorder (!%p191_p9), %s8690_s16, %s6672_s25 }
  0x15   : > { %s219_s7 = scalar_select %p218_p10, %s6789_s22, 1  ;;  %v5876_v16 = vld [vmem:[%s8731_s1 + $0x2a4] ss:$48 sps:$4 sm:$0xff]   ;;  %2186 = vmatprep.subr.bf16.mxu0 %v5900_v13  ;;  %v5908_v18 = vld [vmem:[%s8731_s1 + $0x70] ss:$48 sps:$4 sm:$0xff]  }
  0x16   : > { %2187 = vmatpush1.bf16.msra.mxu0 %v5902_v14  ;;  %v5906_v17 = vld [vmem:[%s8731_s1 + $0x74] ss:$48 sps:$4 sm:$0xff]   ;;  %v5878_v20 = vld [vmem:[%s8731_s1 + $0x2a0] ss:$48 sps:$4 sm:$0xff]   ;;  %s4965_s22 = scalar_lea.sflag [#allocation3], %s215_s11  ;;  %p6674_p12 = pnand %p6673_p11, %p6806_p5 }
  0x17   : > { %2027 = vmatpush1.bf16.msra.mxu1 %v5863_v5  ;;  %s5813_s12 = smul.u32 24, %s219_s7  ;;  %2188 = vmatprep.subr.bf16.mxu0 %v5906_v17  ;;  %v5912_v22 = vld [vmem:[%s8731_s1 + $0xd4] ss:$48 sps:$4 sm:$0xff]   ;;  %v5914_v23 = vld [vmem:[%s8731_s1 + $0xd0] ss:$48 sps:$4 sm:$0xff]  }
  0x18   : > { %2028 = vmatprep.subr.bf16.mxu1 %v5864_v6  ;;  %v5879_v24 = vld [vmem:[%s8731_s1 + $0x304] ss:$48 sps:$4 sm:$0xff]   ;;  %v5881_v26 = vld [vmem:[%s8731_s1 + $0x300] ss:$48 sps:$4 sm:$0xff]   ;;  %p6675_p13 = pneg %p6674_p12 }
  0x19   : > { %s6866_s7 = scalar_lea.vmem %s8730_s0, %s5813_s12  ;;  %v5918_v25 = vld [vmem:[%s8731_s1 + $0x134] ss:$48 sps:$4 sm:$0xff]   ;;  %v5920_v27 = vld [vmem:[%s8731_s1 + $0x130] ss:$48 sps:$4 sm:$0xff]  }
  0x1a   : > { %v225_v19 = vld [vmem:[%s6866_s7 + $0x8] sm:$0xff]  ;;  %2189 = vmatpush1.bf16.msra.mxu0 %v5908_v18  ;;  %v5882_v28 = vld [vmem:[%s8731_s1 + $0x364] ss:$48 sps:$4 sm:$0xff]   ;;  %v5884_v30 = vld [vmem:[%s8731_s1 + $0x360] ss:$48 sps:$4 sm:$0xff]  }
  0x1b   : > { %2029 = vmatpush1.bf16.msra.mxu1 %v5866_v7  ;;  %v6884_v21 = vpack.c.bf16 %v225_v19, %v225_v19  ;;  %2190 = vmatprep.subr.bf16.mxu0 %v5912_v22  ;;  %v5924_v29 = vld [vmem:[%s8731_s1 + $0x194] ss:$48 sps:$4 sm:$0xff]   ;;  %v5926_v31 = vld [vmem:[%s8731_s1 + $0x190] ss:$48 sps:$4 sm:$0xff]  }
  0x1c   : > { %2030 = vmatprep.subr.bf16.mxu1 %v5867_v8  ;;  %v5885_v32 = vld [vmem:[%s8731_s1 + $0x3c4] ss:$48 sps:$4 sm:$0xff]   ;;  %v5887_v34 = vld [vmem:[%s8731_s1 + $0x3c0] ss:$48 sps:$4 sm:$0xff]  }
  0x1d   : > { %2054 = vmatprep.mubr.bf16.mxu1 %v6884_v21  ;;  %2218 = vmatprep.mubr.bf16.mxu0 %v6884_v21  ;;  %v5930_v33 = vld [vmem:[%s8731_s1 + $0x1f4] ss:$48 sps:$4 sm:$0xff]   ;;  %v5932_v35 = vld [vmem:[%s8731_s1 + $0x1f0] ss:$48 sps:$4 sm:$0xff]  }
  0x1e   : > { %2191 = vmatpush1.bf16.msra.mxu0 %v5914_v23  ;;  %v5888_v36 = vld [vmem:[%s8731_s1 + $0x424] ss:$48 sps:$4 sm:$0xff]   ;;  %v5890_v38 = vld [vmem:[%s8731_s1 + $0x420] ss:$48 sps:$4 sm:$0xff]  }
  0x1f   : > { %2031 = vmatpush1.bf16.msra.mxu1 %v5869_v9  ;;  %2192 = vmatprep.subr.bf16.mxu0 %v5918_v25  ;;  %v5936_v37 = vld [vmem:[%s8731_s1 + $0x254] ss:$48 sps:$4 sm:$0xff]   ;;  %v5938_v39 = vld [vmem:[%s8731_s1 + $0x250] ss:$48 sps:$4 sm:$0xff]  }
  0x20   : > { %2032 = vmatprep.subr.bf16.mxu1 %v5870_v10  ;;  %v5891_v40 = vld [vmem:[%s8731_s1 + $0x484] ss:$48 sps:$4 sm:$0xff]   ;;  %v5893_v42 = vld [vmem:[%s8731_s1 + $0x480] ss:$48 sps:$4 sm:$0xff]  }
  0x21   : > { %v5942_v41 = vld [vmem:[%s8731_s1 + $0x2b4] ss:$48 sps:$4 sm:$0xff]   ;;  %v5944_v43 = vld [vmem:[%s8731_s1 + $0x2b0] ss:$48 sps:$4 sm:$0xff]  }
  0x22   : > { %2193 = vmatpush1.bf16.msra.mxu0 %v5920_v27  ;;  %v5894_v44 = vld [vmem:[%s8731_s1 + $0x4e4] ss:$48 sps:$4 sm:$0xff]   ;;  %v5896_v46 = vld [vmem:[%s8731_s1 + $0x4e0] ss:$48 sps:$4 sm:$0xff]  }
  0x23   : > { %2033 = vmatpush1.bf16.msra.mxu1 %v5872_v11  ;;  %2194 = vmatprep.subr.bf16.mxu0 %v5924_v29  ;;  %v5948_v45 = vld [vmem:[%s8731_s1 + $0x314] ss:$48 sps:$4 sm:$0xff]   ;;  %v5950_v47 = vld [vmem:[%s8731_s1 + $0x310] ss:$48 sps:$4 sm:$0xff]  }
  0x24   : > { %2034 = vmatprep.subr.bf16.mxu1 %v5873_v12  ;;  %v5897_v48 = vld [vmem:[%s8731_s1 + $0x544] ss:$48 sps:$4 sm:$0xff]   ;;  %v5899_v50 = vld [vmem:[%s8731_s1 + $0x540] ss:$48 sps:$4 sm:$0xff]  }
  0x25   : > { %v5954_v49 = vld [vmem:[%s8731_s1 + $0x374] ss:$48 sps:$4 sm:$0xff]   ;;  %v5956_v51 = vld [vmem:[%s8731_s1 + $0x370] ss:$48 sps:$4 sm:$0xff]  }
  0x26   : > { %2195 = vmatpush1.bf16.msra.mxu0 %v5926_v31  ;;  %v5903_v52 = vld [vmem:[%s8731_s1 + $0x5a4] ss:$48 sps:$4 sm:$0xff]   ;;  %v5905_v54 = vld [vmem:[%s8731_s1 + $0x5a0] ss:$48 sps:$4 sm:$0xff]  }
  0x27   : > { %2035 = vmatpush1.bf16.msra.mxu1 %v5875_v15  ;;  %2196 = vmatprep.subr.bf16.mxu0 %v5930_v33  ;;  %v5960_v53 = vld [vmem:[%s8731_s1 + $0x3d4] ss:$48 sps:$4 sm:$0xff]   ;;  %v5962_v56 = vld [vmem:[%s8731_s1 + $0x3d0] ss:$48 sps:$4 sm:$0xff]   ;;  %v5965_v33 = vld [vmem:[%s8731_s1 + $0x6c] ss:$48 sps:$4 sm:$0xff]  }
  0x28   : > { %2036 = vmatprep.subr.bf16.mxu1 %v5876_v16  ;;  %v224_v55 = vld [vmem:[%s6866_s7] sm:$0xff]  ;;  %v226_v27 = vld [vmem:[%s6866_s7 + $0x10] sm:$0xff]  ;;  %s6737_s7 = smov [#allocation2]  }
  0x29   : > { %v5911_v57 = vld [vmem:[%s8731_s1 + $0x604] ss:$48 sps:$4 sm:$0xff]   ;;  %v6997_v59 = vpack.c.bf16 %v224_v55, %v224_v55  ;;  %v5909_v60 = vld [vmem:[%s8731_s1 + $0x600] ss:$48 sps:$4 sm:$0xff]   ;;  %v7100_v31 = vpack.c.bf16 %v226_v27, %v226_v27  ;;  %v6041_v27 = vld [vmem:[%s8731_s1 + $0x548] ss:$48 sps:$4 sm:$0xff]  }
  0x2a   : > { %2197 = vmatpush1.bf16.msra.mxu0 %v5932_v35  ;;  %v5966_v58 = vld [vmem:[%s8731_s1 + $0x434] ss:$48 sps:$4 sm:$0xff]   ;;  %v5968_v62 = vld [vmem:[%s8731_s1 + $0x430] ss:$48 sps:$4 sm:$0xff]   ;;  %s6676_s26 = sshll.u32 %s6737_s7, 4  ;;  %s6677_s26 = int_to_ptr.vmem [resolvable:$false] %s6676_s26 }
  0x2b   : > { %2037 = vmatpush1.bf16.msra.mxu1 %v5878_v20  ;;  %2198 = vmatprep.subr.bf16.mxu0 %v5936_v37  ;;  %v5917_v61 = vld [vmem:[%s8731_s1 + $0x664] ss:$48 sps:$4 sm:$0xff]   ;;  %v5915_v0 = vld [vmem:[%s8731_s1 + $0x660] ss:$48 sps:$4 sm:$0xff]   ;;  %v5971_v37 = vld [vmem:[%s8731_s1 + $0xcc] ss:$48 sps:$4 sm:$0xff]   ;;  %p6679_p0 = scmp.lt.s32.totalorder %s8690_s16, %s6677_s26 }
  0x2c   : > { %2038 = vmatprep.subr.bf16.mxu1 %v5879_v24  ;;  %v5972_v63 = vld [vmem:[%s8731_s1 + $0x494] ss:$48 sps:$4 sm:$0xff]   ;;  %v5974_v3 = vld [vmem:[%s8731_s1 + $0x490] ss:$48 sps:$4 sm:$0xff]   ;;  %s6678_s30 = scalar_lea.vmem %s6677_s26, 768 }
  0x2d   : > { %v5923_v2 = vld [vmem:[%s8731_s1 + $0x6c4] ss:$48 sps:$4 sm:$0xff]   ;;  %v5921_v5 = vld [vmem:[%s8731_s1 + $0x6c0] ss:$48 sps:$4 sm:$0xff]   ;;  %p6680_p1 = scmp.lt.s32.totalorder %s6678_s30, %s6672_s25 }
  0x2e   : > { %2199 = vmatpush1.bf16.msra.mxu0 %v5938_v39  ;;  %v5978_v4 = vld [vmem:[%s8731_s1 + $0x4f4] ss:$48 sps:$4 sm:$0xff]   ;;  %v5980_v7 = vld [vmem:[%s8731_s1 + $0x4f0] ss:$48 sps:$4 sm:$0xff]  }
  0x2f   : > { %2039 = vmatpush1.bf16.msra.mxu1 %v5881_v26  ;;  %2200 = vmatprep.subr.bf16.mxu0 %v5942_v41  ;;  %v5929_v6 = vld [vmem:[%s8731_s1 + $0x724] ss:$48 sps:$4 sm:$0xff]   ;;  %v5927_v9 = vld [vmem:[%s8731_s1 + $0x720] ss:$48 sps:$4 sm:$0xff]   ;;  %v5977_v41 = vld [vmem:[%s8731_s1 + $0x12c] ss:$48 sps:$4 sm:$0xff]   ;;  %p6681_p2 = por %p6680_p1, %p6679_p0 }
  0x30   : > { %2040 = vmatprep.subr.bf16.mxu1 %v5882_v28  ;;  %v5984_v8 = vld [vmem:[%s8731_s1 + $0x554] ss:$48 sps:$4 sm:$0xff]   ;;  %v5986_v11 = vld [vmem:[%s8731_s1 + $0x550] ss:$48 sps:$4 sm:$0xff]   ;;  %v5959_v28 = vld [vmem:[%s8731_s1 + $0xc] ss:$48 sps:$4 sm:$0xff]  }
  0x31   : > { %v5935_v10 = vld [vmem:[%s8731_s1 + $0x784] ss:$48 sps:$4 sm:$0xff]   ;;  %v5933_v13 = vld [vmem:[%s8731_s1 + $0x780] ss:$48 sps:$4 sm:$0xff]   ;;  %p6682_p3 = pnand %p6681_p2, %p6675_p13 }
  0x32   : > { %2201 = vmatpush1.bf16.msra.mxu0 %v5944_v43  ;;  %v5990_v12 = vld [vmem:[%s8731_s1 + $0x5b4] ss:$48 sps:$4 sm:$0xff]   ;;  %v5992_v15 = vld [vmem:[%s8731_s1 + $0x5b0] ss:$48 sps:$4 sm:$0xff]  }
  0x33   : > { %2041 = vmatpush1.bf16.msra.mxu1 %v5884_v30  ;;  %2202 = vmatprep.subr.bf16.mxu0 %v5948_v45  ;;  %v5941_v14 = vld [vmem:[%s8731_s1 + $0x7e4] ss:$48 sps:$4 sm:$0xff]   ;;  %v5939_v17 = vld [vmem:[%s8731_s1 + $0x7e0] ss:$48 sps:$4 sm:$0xff]   ;;  %v5983_v45 = vld [vmem:[%s8731_s1 + $0x18c] ss:$48 sps:$4 sm:$0xff]  }
  0x34   : > { %2042 = vmatprep.subr.bf16.mxu1 %v5885_v32  ;;  %v5998_v16 = vld [vmem:[%s8731_s1 + $0x614] ss:$48 sps:$4 sm:$0xff]   ;;  %v5996_v19 = vld [vmem:[%s8731_s1 + $0x610] ss:$48 sps:$4 sm:$0xff]   ;;  %v5957_v32 = vld [vmem:[%s8731_s1 + $0x8] ss:$48 sps:$4 sm:$0xff]  }
  0x35   : > { %v5947_v18 = vld [vmem:[%s8731_s1 + $0x844] ss:$48 sps:$4 sm:$0xff]   ;;  %v5945_v22 = vld [vmem:[%s8731_s1 + $0x840] ss:$48 sps:$4 sm:$0xff]  }
  0x36   : > { %2203 = vmatpush1.bf16.msra.mxu0 %v5950_v47  ;;  %v6004_v20 = vld [vmem:[%s8731_s1 + $0x674] ss:$48 sps:$4 sm:$0xff]   ;;  %v6002_v24 = vld [vmem:[%s8731_s1 + $0x670] ss:$48 sps:$4 sm:$0xff]  }
  0x37   : > { %2043 = vmatpush1.bf16.msra.mxu1 %v5887_v34  ;;  %2204 = vmatprep.subr.bf16.mxu0 %v5954_v49  ;;  %v5953_v23 = vld [vmem:[%s8731_s1 + $0x8a4] ss:$48 sps:$4 sm:$0xff]   ;;  %v5951_v26 = vld [vmem:[%s8731_s1 + $0x8a0] ss:$48 sps:$4 sm:$0xff]   ;;  %v5989_v49 = vld [vmem:[%s8731_s1 + $0x1ec] ss:$48 sps:$4 sm:$0xff]  }
  0x38   : > { %2044 = vmatprep.subr.bf16.mxu1 %v5888_v36  ;;  %v6010_v25 = vld [vmem:[%s8731_s1 + $0x6d4] ss:$48 sps:$4 sm:$0xff]   ;;  %v6008_v29 = vld [vmem:[%s8731_s1 + $0x6d0] ss:$48 sps:$4 sm:$0xff]   ;;  %v5963_v36 = vld [vmem:[%s8731_s1 + $0x68] ss:$48 sps:$4 sm:$0xff]  }
  0x39   : > { %v6016_v30 = vld [vmem:[%s8731_s1 + $0x734] ss:$48 sps:$4 sm:$0xff]   ;;  %v6014_v34 = vld [vmem:[%s8731_s1 + $0x730] ss:$48 sps:$4 sm:$0xff]  }
  0x3a   : > { %2205 = vmatpush1.bf16.msra.mxu0 %v5956_v51  ;;  %v6022_v35 = vld [vmem:[%s8731_s1 + $0x794] ss:$48 sps:$4 sm:$0xff]  }
  0x3b   : > { %2045 = vmatpush1.bf16.msra.mxu1 %v5890_v38  ;;  %2206 = vmatprep.subr.bf16.mxu0 %v5960_v53  ;;  %v6020_v38 = vld [vmem:[%s8731_s1 + $0x790] ss:$48 sps:$4 sm:$0xff]   ;;  %v6028_v39 = vld [vmem:[%s8731_s1 + $0x7f4] ss:$48 sps:$4 sm:$0xff]   ;;  %v5995_v53 = vld [vmem:[%s8731_s1 + $0x24c] ss:$48 sps:$4 sm:$0xff]  }
  0x3c   : > { %2046 = vmatprep.subr.bf16.mxu1 %v5891_v40  ;;  %v5969_v40 = vld [vmem:[%s8731_s1 + $0xc8] ss:$48 sps:$4 sm:$0xff]   ;;  %v6034_v43 = vld [vmem:[%s8731_s1 + $0x854] ss:$48 sps:$4 sm:$0xff]  }
  0x3d   : > { %v6040_v47 = vld [vmem:[%s8731_s1 + $0x8b4] ss:$48 sps:$4 sm:$0xff]  }
  0x3e   : > { %2207 = vmatpush1.bf16.msra.mxu0 %v5962_v56  ;;  %v6046_v51 = vld [vmem:[%s8731_s1 + $0x24] ss:$48 sps:$4 sm:$0xff]   ;;  %v5993_v56 = vld [vmem:[%s8731_s1 + $0x248] ss:$48 sps:$4 sm:$0xff]  }
  0x3f   : > { %2047 = vmatpush1.bf16.msra.mxu1 %v5893_v42  ;;  %2208 = vmatprep.subr.bf16.mxu0 %v5966_v58  ;;  %v6026_v42 = vld [vmem:[%s8731_s1 + $0x7f0] ss:$48 sps:$4 sm:$0xff]   ;;  %v6052_v55 = vld [vmem:[%s8731_s1 + $0x84] ss:$48 sps:$4 sm:$0xff]  }
  0x40   : > { %2048 = vmatprep.subr.bf16.mxu1 %v5894_v44  ;;  %v5975_v44 = vld [vmem:[%s8731_s1 + $0x128] ss:$48 sps:$4 sm:$0xff]   ;;  %v6050_v58 = vld [vmem:[%s8731_s1 + $0x80] ss:$48 sps:$4 sm:$0xff]  }
  0x42   : > { %2209 = vmatpush1.bf16.msra.mxu0 %v5968_v62  ;;  %v6007_v62 = vld [vmem:[%s8731_s1 + $0x30c] ss:$48 sps:$4 sm:$0xff]  }
  0x43   : > { %2049 = vmatpush1.bf16.msra.mxu1 %v5896_v46  ;;  %2210 = vmatprep.subr.bf16.mxu0 %v5972_v63  ;;  %v6032_v46 = vld [vmem:[%s8731_s1 + $0x850] ss:$48 sps:$4 sm:$0xff]  }
  0x44   : > { %2050 = vmatprep.subr.bf16.mxu1 %v5897_v48  ;;  %v5981_v48 = vld [vmem:[%s8731_s1 + $0x188] ss:$48 sps:$4 sm:$0xff]   ;;  %v6056_v63 = vld [vmem:[%s8731_s1 + $0xe0] ss:$48 sps:$4 sm:$0xff]  }
  0x46   : > { %2211 = vmatpush1.bf16.msra.mxu0 %v5974_v3  ;;  %v6013_v3 = vld [vmem:[%s8731_s1 + $0x36c] ss:$48 sps:$4 sm:$0xff]  }
  0x47   : > { %2051 = vmatpush1.bf16.msra.mxu1 %v5899_v50  ;;  %2212 = vmatprep.subr.bf16.mxu0 %v5978_v4  ;;  %v6038_v50 = vld [vmem:[%s8731_s1 + $0x8b0] ss:$48 sps:$4 sm:$0xff]  }
  0x48   : > { %2052 = vmatprep.subr.bf16.mxu1 %v5903_v52  ;;  %v5987_v52 = vld [vmem:[%s8731_s1 + $0x1e8] ss:$48 sps:$4 sm:$0xff]   ;;  %v6062_v4 = vld [vmem:[%s8731_s1 + $0x140] ss:$48 sps:$4 sm:$0xff]  }
  0x4a   : > { %2213 = vmatpush1.bf16.msra.mxu0 %v5980_v7  ;;  %v6019_v7 = vld [vmem:[%s8731_s1 + $0x3cc] ss:$48 sps:$4 sm:$0xff]  }
  0x4b   : > { %2053 = vmatpush1.bf16.msra.mxu1 %v5905_v54  ;;  %2214 = vmatprep.subr.bf16.mxu0 %v5984_v8  ;;  %v6044_v54 = vld [vmem:[%s8731_s1 + $0x20] ss:$48 sps:$4 sm:$0xff]  }
  0x4c   : > { %2063 = vmatprep.subr.bf16.mxu1 %v5911_v57  ;;  %v6001_v57 = vld [vmem:[%s8731_s1 + $0x2ac] ss:$48 sps:$4 sm:$0xff]   ;;  %v6068_v8 = vld [vmem:[%s8731_s1 + $0x1a0] ss:$48 sps:$4 sm:$0xff]  }
  0x4e   : > { %2055 = vmatmul.mubr.bf16.vlgmr.msra.gmra.mrb[0].mxu1 %v6997_v59  ;;  %2215 = vmatpush1.bf16.msra.mxu0 %v5986_v11  ;;  %v6025_v11 = vld [vmem:[%s8731_s1 + $0x42c] ss:$48 sps:$4 sm:$0xff]  }
  0x4f   : > { %2064 = vmatpush1.bf16.msra.mxu1 %v5909_v60  ;;  %2095 = vmatprep.mubr.bf16.mxu1 %v6736_v1  ;;  %v6058_v60 = vld [vmem:[%s8731_s1 + $0xe4] ss:$48 sps:$4 sm:$0xff]  }
  0x50   : > { %2065 = vmatprep.subr.bf16.mxu1 %v5917_v61  ;;  %2216 = vmatprep.subr.bf16.mxu0 %v5990_v12  ;;  %v5999_v61 = vld [vmem:[%s8731_s1 + $0x2a8] ss:$48 sps:$4 sm:$0xff]   ;;  %v6074_v12 = vld [vmem:[%s8731_s1 + $0x200] ss:$48 sps:$4 sm:$0xff]  }
  0x52   : > { %2217 = vmatpush1.bf16.msra.mxu0 %v5992_v15  ;;  %v6031_v15 = vld [vmem:[%s8731_s1 + $0x48c] ss:$48 sps:$4 sm:$0xff]  }
  0x53   : > { %2066 = vmatpush1.bf16.msra.mxu1 %v5915_v0  ;;  %2227 = vmatprep.subr.bf16.mxu0 %v5998_v16  ;;  %v6064_v0 = vld [vmem:[%s8731_s1 + $0x144] ss:$48 sps:$4 sm:$0xff]   ;;  %v6080_v16 = vld [vmem:[%s8731_s1 + $0x260] ss:$48 sps:$4 sm:$0xff]  }
  0x54   : > { %2067 = vmatprep.subr.bf16.mxu1 %v5923_v2  ;;  %v6005_v2 = vld [vmem:[%s8731_s1 + $0x308] ss:$48 sps:$4 sm:$0xff]  }
  0x55   : > { %2219 = vmatmul.mubr.bf16.vlgmr.msra.gmra.mrb[0].mxu0 %v6997_v59 }
  0x56   : > { %2228 = vmatpush1.bf16.msra.mxu0 %v5996_v19  ;;  %2259 = vmatprep.mubr.bf16.mxu0 %v6736_v1  ;;  %v6037_v19 = vld [vmem:[%s8731_s1 + $0x4ec] ss:$48 sps:$4 sm:$0xff]  }
  0x57   : > { %2068 = vmatpush1.bf16.msra.mxu1 %v5921_v5  ;;  %2229 = vmatprep.subr.bf16.mxu0 %v6004_v20  ;;  %v6070_v5 = vld [vmem:[%s8731_s1 + $0x1a4] ss:$48 sps:$4 sm:$0xff]   ;;  %v6086_v20 = vld [vmem:[%s8731_s1 + $0x2c0] ss:$48 sps:$4 sm:$0xff]  }
  0x58   : > { %2069 = vmatprep.subr.bf16.mxu1 %v5929_v6  ;;  %v6011_v6 = vld [vmem:[%s8731_s1 + $0x368] ss:$48 sps:$4 sm:$0xff]  }
  0x5a   : > { %2230 = vmatpush1.bf16.msra.mxu0 %v6002_v24  ;;  %v6043_v24 = vld [vmem:[%s8731_s1 + $0x54c] ss:$48 sps:$4 sm:$0xff]  }
  0x5b   : > { %2070 = vmatpush1.bf16.msra.mxu1 %v5927_v9  ;;  %2231 = vmatprep.subr.bf16.mxu0 %v6010_v25  ;;  %v6076_v9 = vld [vmem:[%s8731_s1 + $0x204] ss:$48 sps:$4 sm:$0xff]   ;;  %v6092_v25 = vld [vmem:[%s8731_s1 + $0x320] ss:$48 sps:$4 sm:$0xff]  }
  0x5c   : > { %2071 = vmatprep.subr.bf16.mxu1 %v5935_v10  ;;  %v6017_v10 = vld [vmem:[%s8731_s1 + $0x3c8] ss:$48 sps:$4 sm:$0xff]  }
  0x5e   : > { %2232 = vmatpush1.bf16.msra.mxu0 %v6008_v29  ;;  %v6098_v29 = vld [vmem:[%s8731_s1 + $0x380] ss:$48 sps:$4 sm:$0xff]  }
  0x5f   : > { %2072 = vmatpush1.bf16.msra.mxu1 %v5933_v13  ;;  %2233 = vmatprep.subr.bf16.mxu0 %v6016_v30  ;;  %v6082_v13 = vld [vmem:[%s8731_s1 + $0x264] ss:$48 sps:$4 sm:$0xff]  }
  0x60   : > { %2073 = vmatprep.subr.bf16.mxu1 %v5941_v14  ;;  %v6023_v14 = vld [vmem:[%s8731_s1 + $0x428] ss:$48 sps:$4 sm:$0xff]   ;;  %v6106_v30 = vld [vmem:[%s8731_s1 + $0x3e4] ss:$48 sps:$4 sm:$0xff]  }
  0x62   : > { %2234 = vmatpush1.bf16.msra.mxu0 %v6014_v34  ;;  %v6104_v34 = vld [vmem:[%s8731_s1 + $0x3e0] ss:$48 sps:$4 sm:$0xff]  }
  0x63   : > { %2074 = vmatpush1.bf16.msra.mxu1 %v5939_v17  ;;  %2235 = vmatprep.subr.bf16.mxu0 %v6022_v35  ;;  %v6088_v17 = vld [vmem:[%s8731_s1 + $0x2c4] ss:$48 sps:$4 sm:$0xff]  }
  0x64   : > { %2075 = vmatprep.subr.bf16.mxu1 %v5947_v18  ;;  %v6029_v18 = vld [vmem:[%s8731_s1 + $0x488] ss:$48 sps:$4 sm:$0xff]   ;;  %v6112_v35 = vld [vmem:[%s8731_s1 + $0x444] ss:$48 sps:$4 sm:$0xff]  }
  0x66   : > { %2236 = vmatpush1.bf16.msra.mxu0 %v6020_v38  ;;  %v6110_v38 = vld [vmem:[%s8731_s1 + $0x440] ss:$48 sps:$4 sm:$0xff]  }
  0x67   : > { %2076 = vmatpush1.bf16.msra.mxu1 %v5945_v22  ;;  %2237 = vmatprep.subr.bf16.mxu0 %v6028_v39  ;;  %v6094_v22 = vld [vmem:[%s8731_s1 + $0x324] ss:$48 sps:$4 sm:$0xff]  }
  0x68   : > { %2077 = vmatprep.subr.bf16.mxu1 %v5953_v23  ;;  %v6035_v23 = vld [vmem:[%s8731_s1 + $0x4e8] ss:$48 sps:$4 sm:$0xff]   ;;  %v6118_v39 = vld [vmem:[%s8731_s1 + $0x4a4] ss:$48 sps:$4 sm:$0xff]  }
  0x6a   : > { %2238 = vmatpush1.bf16.msra.mxu0 %v6026_v42  ;;  %v6116_v42 = vld [vmem:[%s8731_s1 + $0x4a0] ss:$48 sps:$4 sm:$0xff]  }
  0x6b   : > { %2078 = vmatpush1.bf16.msra.mxu1 %v5951_v26  ;;  %2239 = vmatprep.subr.bf16.mxu0 %v6034_v43  ;;  %v6100_v26 = vld [vmem:[%s8731_s1 + $0x384] ss:$48 sps:$4 sm:$0xff]  }
  0x6c   : > { %2104 = vmatprep.subr.bf16.mxu1 %v5959_v28  ;;  %v6049_v28 = vld [vmem:[%s8731_s1 + $0x5ac] ss:$48 sps:$4 sm:$0xff]   ;;  %v6124_v43 = vld [vmem:[%s8731_s1 + $0x504] ss:$48 sps:$4 sm:$0xff]  }
  0x6e   : > { %2096 = vmatmul.mubr.bf16.vlgmr.msra.gmra.mrb[0].mxu1 %v7100_v31  ;;  %2240 = vmatpush1.bf16.msra.mxu0 %v6032_v46  ;;  %v6122_v46 = vld [vmem:[%s8731_s1 + $0x500] ss:$48 sps:$4 sm:$0xff]  }
  0x6f   : > { %2105 = vmatpush1.bf16.msra.mxu1 %v5957_v32  ;;  %2136 = vmatprep.mubr.bf16.mxu1 %v6884_v21  ;;  %v6047_v32 = vld [vmem:[%s8731_s1 + $0x5a8] ss:$48 sps:$4 sm:$0xff]  }
  0x70   : > { %2106 = vmatprep.subr.bf16.mxu1 %v5965_v33  ;;  %2241 = vmatprep.subr.bf16.mxu0 %v6040_v47  ;;  %v6055_v33 = vld [vmem:[%s8731_s1 + $0x60c] ss:$48 sps:$4 sm:$0xff]   ;;  %v6130_v47 = vld [vmem:[%s8731_s1 + $0x564] ss:$48 sps:$4 sm:$0xff]  }
  0x72   : > { %2242 = vmatpush1.bf16.msra.mxu0 %v6038_v50  ;;  %v6128_v50 = vld [vmem:[%s8731_s1 + $0x560] ss:$48 sps:$4 sm:$0xff]  }
  0x73   : > { %2107 = vmatpush1.bf16.msra.mxu1 %v5963_v36  ;;  %2350 = vmatprep.subr.bf16.mxu0 %v6046_v51  ;;  %v6053_v36 = vld [vmem:[%s8731_s1 + $0x608] ss:$48 sps:$4 sm:$0xff]   ;;  %v6136_v51 = vld [vmem:[%s8731_s1 + $0x5c4] ss:$48 sps:$4 sm:$0xff]  }
  0x74   : > { %2108 = vmatprep.subr.bf16.mxu1 %v5971_v37  ;;  %v6061_v37 = vld [vmem:[%s8731_s1 + $0x66c] ss:$48 sps:$4 sm:$0xff]  }
  0x75   : > { %2260 = vmatmul.mubr.bf16.vlgmr.msra.gmra.mrb[0].mxu0 %v7100_v31 }
  0x76   : > { %2351 = vmatpush1.bf16.msra.mxu0 %v6044_v54  ;;  %2382 = vmatprep.mubr.bf16.mxu0 %v6884_v21  ;;  %v6134_v54 = vld [vmem:[%s8731_s1 + $0x5c0] ss:$48 sps:$4 sm:$0xff]  }
  0x77   : > { %2109 = vmatpush1.bf16.msra.mxu1 %v5969_v40  ;;  %2352 = vmatprep.subr.bf16.mxu0 %v6052_v55  ;;  %v6059_v40 = vld [vmem:[%s8731_s1 + $0x668] ss:$48 sps:$4 sm:$0xff]   ;;  %v6142_v55 = vld [vmem:[%s8731_s1 + $0x624] ss:$48 sps:$4 sm:$0xff]  }
  0x78   : > { %2110 = vmatprep.subr.bf16.mxu1 %v5977_v41  ;;  %v6067_v41 = vld [vmem:[%s8731_s1 + $0x6cc] ss:$48 sps:$4 sm:$0xff]  }
  0x7a   : > { %2353 = vmatpush1.bf16.msra.mxu0 %v6050_v58  ;;  %v6140_v58 = vld [vmem:[%s8731_s1 + $0x620] ss:$48 sps:$4 sm:$0xff]  }
  0x7b   : > { %2111 = vmatpush1.bf16.msra.mxu1 %v5975_v44  ;;  %2354 = vmatprep.subr.bf16.mxu0 %v6058_v60  ;;  %v6065_v44 = vld [vmem:[%s8731_s1 + $0x6c8] ss:$48 sps:$4 sm:$0xff]   ;;  %v6148_v60 = vld [vmem:[%s8731_s1 + $0x684] ss:$48 sps:$4 sm:$0xff]  }
  0x7c   : > { %2112 = vmatprep.subr.bf16.mxu1 %v5983_v45  ;;  %v6073_v45 = vld [vmem:[%s8731_s1 + $0x72c] ss:$48 sps:$4 sm:$0xff]  }
  0x7e   : > { %2355 = vmatpush1.bf16.msra.mxu0 %v6056_v63  ;;  %v6146_v63 = vld [vmem:[%s8731_s1 + $0x680] ss:$48 sps:$4 sm:$0xff]  }
  0x7f   : > { %2113 = vmatpush1.bf16.msra.mxu1 %v5981_v48  ;;  %2356 = vmatprep.subr.bf16.mxu0 %v6064_v0  ;;  %v6071_v48 = vld [vmem:[%s8731_s1 + $0x728] ss:$48 sps:$4 sm:$0xff]   ;;  %v6154_v0 = vld [vmem:[%s8731_s1 + $0x6e4] ss:$48 sps:$4 sm:$0xff]  }
  0x80   : > { %2114 = vmatprep.subr.bf16.mxu1 %v5989_v49  ;;  %v6079_v49 = vld [vmem:[%s8731_s1 + $0x78c] ss:$48 sps:$4 sm:$0xff]  }
  0x82   : > { %2357 = vmatpush1.bf16.msra.mxu0 %v6062_v4  ;;  %v6152_v4 = vld [vmem:[%s8731_s1 + $0x6e0] ss:$48 sps:$4 sm:$0xff]  }
  0x83   : > { %2115 = vmatpush1.bf16.msra.mxu1 %v5987_v52  ;;  %2358 = vmatprep.subr.bf16.mxu0 %v6070_v5  ;;  %v6077_v52 = vld [vmem:[%s8731_s1 + $0x788] ss:$48 sps:$4 sm:$0xff]   ;;  %v6160_v5 = vld [vmem:[%s8731_s1 + $0x744] ss:$48 sps:$4 sm:$0xff]  }
  0x84   : > { %2116 = vmatprep.subr.bf16.mxu1 %v5995_v53  ;;  %v6085_v53 = vld [vmem:[%s8731_s1 + $0x7ec] ss:$48 sps:$4 sm:$0xff]  }
  0x86   : > { %2359 = vmatpush1.bf16.msra.mxu0 %v6068_v8  ;;  %v6158_v8 = vld [vmem:[%s8731_s1 + $0x740] ss:$48 sps:$4 sm:$0xff]  }
  0x87   : > { %2117 = vmatpush1.bf16.msra.mxu1 %v5993_v56  ;;  %2360 = vmatprep.subr.bf16.mxu0 %v6076_v9  ;;  %v6083_v56 = vld [vmem:[%s8731_s1 + $0x7e8] ss:$48 sps:$4 sm:$0xff]   ;;  %v6166_v9 = vld [vmem:[%s8731_s1 + $0x7a4] ss:$48 sps:$4 sm:$0xff]  }
  0x88   : > { %2118 = vmatprep.subr.bf16.mxu1 %v6001_v57  ;;  %v6091_v57 = vld [vmem:[%s8731_s1 + $0x84c] ss:$48 sps:$4 sm:$0xff]  }
  0x8a   : > { %2361 = vmatpush1.bf16.msra.mxu0 %v6074_v12  ;;  %v6164_v12 = vld [vmem:[%s8731_s1 + $0x7a0] ss:$48 sps:$4 sm:$0xff]  }
  0x8b   : > { %2119 = vmatpush1.bf16.msra.mxu1 %v5999_v61  ;;  %2362 = vmatprep.subr.bf16.mxu0 %v6082_v13  ;;  %v6089_v61 = vld [vmem:[%s8731_s1 + $0x848] ss:$48 sps:$4 sm:$0xff]   ;;  %v6172_v13 = vld [vmem:[%s8731_s1 + $0x804] ss:$48 sps:$4 sm:$0xff]  }
  0x8c   : > { %2120 = vmatprep.subr.bf16.mxu1 %v6007_v62  ;;  %v6097_v62 = vld [vmem:[%s8731_s1 + $0x8ac] ss:$48 sps:$4 sm:$0xff]  }
  0x8e   : > { %2363 = vmatpush1.bf16.msra.mxu0 %v6080_v16  ;;  %v6170_v16 = vld [vmem:[%s8731_s1 + $0x800] ss:$48 sps:$4 sm:$0xff]  }
  0x8f   : > { %2121 = vmatpush1.bf16.msra.mxu1 %v6005_v2  ;;  %2364 = vmatprep.subr.bf16.mxu0 %v6088_v17  ;;  %v6095_v2 = vld [vmem:[%s8731_s1 + $0x8a8] ss:$48 sps:$4 sm:$0xff]   ;;  %v6178_v17 = vld [vmem:[%s8731_s1 + $0x864] ss:$48 sps:$4 sm:$0xff]  }
  0x90   : > { %2122 = vmatprep.subr.bf16.mxu1 %v6013_v3  ;;  %v6103_v3 = vld [vmem:[%s8731_s1 + $0x1c] ss:$48 sps:$4 sm:$0xff]  }
  0x92   : > { %2365 = vmatpush1.bf16.msra.mxu0 %v6086_v20  ;;  %v6176_v20 = vld [vmem:[%s8731_s1 + $0x860] ss:$48 sps:$4 sm:$0xff]  }
  0x93   : > { %2123 = vmatpush1.bf16.msra.mxu1 %v6011_v6  ;;  %2366 = vmatprep.subr.bf16.mxu0 %v6094_v22  ;;  %v6101_v6 = vld [vmem:[%s8731_s1 + $0x18] ss:$48 sps:$4 sm:$0xff]   ;;  %v6184_v22 = vld [vmem:[%s8731_s1 + $0x8c4] ss:$48 sps:$4 sm:$0xff]  }
  0x94   : > { %2124 = vmatprep.subr.bf16.mxu1 %v6019_v7  ;;  %v6109_v7 = vld [vmem:[%s8731_s1 + $0x7c] ss:$48 sps:$4 sm:$0xff]  }
  0x96   : > { %2367 = vmatpush1.bf16.msra.mxu0 %v6092_v25  ;;  %v6182_v25 = vld [vmem:[%s8731_s1 + $0x8c0] ss:$48 sps:$4 sm:$0xff]  }
  0x97   : > { %2125 = vmatpush1.bf16.msra.mxu1 %v6017_v10  ;;  %2368 = vmatprep.subr.bf16.mxu0 %v6100_v26  ;;  %v6107_v10 = vld [vmem:[%s8731_s1 + $0x78] ss:$48 sps:$4 sm:$0xff]   ;;  %v6193_v26 = vld [vmem:[%s8733_s3 + $0x4] ss:$12 sps:$4 sm:$0xff]  }
  0x98   : > { %2126 = vmatprep.subr.bf16.mxu1 %v6025_v11  ;;  %v6115_v11 = vld [vmem:[%s8731_s1 + $0xdc] ss:$48 sps:$4 sm:$0xff]  }
  0x9a   : > { %2369 = vmatpush1.bf16.msra.mxu0 %v6098_v29  ;;  %v6191_v29 = vld [vmem:[%s8733_s3] ss:$12 sps:$4 sm:$0xff]  }
  0x9b   : > { %2127 = vmatpush1.bf16.msra.mxu1 %v6023_v14  ;;  %2370 = vmatprep.subr.bf16.mxu0 %v6106_v30  ;;  %v6113_v14 = vld [vmem:[%s8731_s1 + $0xd8] ss:$48 sps:$4 sm:$0xff]  }
  0x9c   : > { %2128 = vmatprep.subr.bf16.mxu1 %v6031_v15  ;;  %v6121_v15 = vld [vmem:[%s8731_s1 + $0x13c] ss:$48 sps:$4 sm:$0xff]  }
  0x9d   : > { %v6199_v30 = vld [vmem:[%s8733_s3 + $0x1c] ss:$12 sps:$4 sm:$0xff]  }
  0x9e   : > { %2371 = vmatpush1.bf16.msra.mxu0 %v6104_v34  ;;  %v6197_v34 = vld [vmem:[%s8733_s3 + $0x18] ss:$12 sps:$4 sm:$0xff]  }
  0x9f   : > { %2129 = vmatpush1.bf16.msra.mxu1 %v6029_v18  ;;  %2372 = vmatprep.subr.bf16.mxu0 %v6112_v35  ;;  %v6119_v18 = vld [vmem:[%s8731_s1 + $0x138] ss:$48 sps:$4 sm:$0xff]   ;;  %v6205_v35 = vld [vmem:[%s8733_s3 + $0x34] ss:$12 sps:$4 sm:$0xff]  }
  0xa0   : > { %2130 = vmatprep.subr.bf16.mxu1 %v6037_v19  ;;  %v6127_v19 = vld [vmem:[%s8731_s1 + $0x19c] ss:$48 sps:$4 sm:$0xff]  }
  0xa2   : > { %2373 = vmatpush1.bf16.msra.mxu0 %v6110_v38  ;;  %v6203_v38 = vld [vmem:[%s8733_s3 + $0x30] ss:$12 sps:$4 sm:$0xff]  }
  0xa3   : > { %2131 = vmatpush1.bf16.msra.mxu1 %v6035_v23  ;;  %2374 = vmatprep.subr.bf16.mxu0 %v6118_v39  ;;  %v6125_v23 = vld [vmem:[%s8731_s1 + $0x198] ss:$48 sps:$4 sm:$0xff]  }
  0xa4   : > { %2132 = vmatprep.subr.bf16.mxu1 %v6043_v24  ;;  %v6133_v24 = vld [vmem:[%s8731_s1 + $0x1fc] ss:$48 sps:$4 sm:$0xff]  }
  0xa5   : > { %v6211_v39 = vld [vmem:[%s8733_s3 + $0x4c] ss:$12 sps:$4 sm:$0xff]  }
  0xa6   : > { %2375 = vmatpush1.bf16.msra.mxu0 %v6116_v42  ;;  %v6209_v42 = vld [vmem:[%s8733_s3 + $0x48] ss:$12 sps:$4 sm:$0xff]  }
  0xa7   : > { %2133 = vmatpush1.bf16.msra.mxu1 %v6041_v27  ;;  %2376 = vmatprep.subr.bf16.mxu0 %v6124_v43  ;;  %v6131_v27 = vld [vmem:[%s8731_s1 + $0x1f8] ss:$48 sps:$4 sm:$0xff]   ;;  %v6217_v43 = vld [vmem:[%s8733_s3 + $0x64] ss:$12 sps:$4 sm:$0xff]  }
  0xa8   : > { %2134 = vmatprep.subr.bf16.mxu1 %v6049_v28  ;;  %v6139_v28 = vld [vmem:[%s8731_s1 + $0x25c] ss:$48 sps:$4 sm:$0xff]  }
  0xaa   : > { %2377 = vmatpush1.bf16.msra.mxu0 %v6122_v46  ;;  %v6215_v46 = vld [vmem:[%s8733_s3 + $0x60] ss:$12 sps:$4 sm:$0xff]  }
  0xab   : > { %2135 = vmatpush1.bf16.msra.mxu1 %v6047_v32  ;;  %2378 = vmatprep.subr.bf16.mxu0 %v6130_v47  ;;  %v6137_v32 = vld [vmem:[%s8731_s1 + $0x258] ss:$48 sps:$4 sm:$0xff]  }
  0xac   : > { %2145 = vmatprep.subr.bf16.mxu1 %v6055_v33  ;;  %v6145_v33 = vld [vmem:[%s8731_s1 + $0x2bc] ss:$48 sps:$4 sm:$0xff]  }
  0xad   : > { %v6223_v47 = vld [vmem:[%s8733_s3 + $0x7c] ss:$12 sps:$4 sm:$0xff]  }
  0xae   : > { %2137 = vmatmul.mubr.bf16.vlgmr.msra.gmra.mrb[4].mxu1 %v6997_v59  ;;  %2379 = vmatpush1.bf16.msra.mxu0 %v6128_v50  ;;  %v6221_v50 = vld [vmem:[%s8733_s3 + $0x78] ss:$12 sps:$4 sm:$0xff]  }
  0xaf   : > { %2146 = vmatpush1.bf16.msra.mxu1 %v6053_v36  ;;  %2177 = vmatprep.mubr.bf16.mxu1 %v6736_v1  ;;  %v6143_v36 = vld [vmem:[%s8731_s1 + $0x2b8] ss:$48 sps:$4 sm:$0xff]  }
  0xb0   : > { %2147 = vmatprep.subr.bf16.mxu1 %v6061_v37  ;;  %2380 = vmatprep.subr.bf16.mxu0 %v6136_v51  ;;  %v6151_v37 = vld [vmem:[%s8731_s1 + $0x31c] ss:$48 sps:$4 sm:$0xff]   ;;  %v6229_v51 = vld [vmem:[%s8733_s3 + $0x94] ss:$12 sps:$4 sm:$0xff]  }
  0xb2   : > { %2381 = vmatpush1.bf16.msra.mxu0 %v6134_v54  ;;  %v6227_v54 = vld [vmem:[%s8733_s3 + $0x90] ss:$12 sps:$4 sm:$0xff]  }
  0xb3   : > { %2148 = vmatpush1.bf16.msra.mxu1 %v6059_v40  ;;  %2391 = vmatprep.subr.bf16.mxu0 %v6142_v55  ;;  %v6149_v40 = vld [vmem:[%s8731_s1 + $0x318] ss:$48 sps:$4 sm:$0xff]  }
  0xb4   : > { %2149 = vmatprep.subr.bf16.mxu1 %v6067_v41  ;;  %v6157_v41 = vld [vmem:[%s8731_s1 + $0x37c] ss:$48 sps:$4 sm:$0xff]  }
  0xb5   : > { %2383 = vmatmul.mubr.bf16.vlgmr.msra.gmra.mrb[4].mxu0 %v6997_v59  ;;  %v6235_v55 = vld [vmem:[%s8733_s3 + $0xac] ss:$12 sps:$4 sm:$0xff]  }
  0xb6   : > { %2392 = vmatpush1.bf16.msra.mxu0 %v6140_v58  ;;  %2423 = vmatprep.mubr.bf16.mxu0 %v6736_v1  ;;  %v6233_v58 = vld [vmem:[%s8733_s3 + $0xa8] ss:$12 sps:$4 sm:$0xff]  }
  0xb7   : > { %2150 = vmatpush1.bf16.msra.mxu1 %v6065_v44  ;;  %2393 = vmatprep.subr.bf16.mxu0 %v6148_v60  ;;  %v6155_v44 = vld [vmem:[%s8731_s1 + $0x378] ss:$48 sps:$4 sm:$0xff]   ;;  %v6241_v60 = vld [vmem:[%s8733_s3 + $0xc4] ss:$12 sps:$4 sm:$0xff]  }
  0xb8   : > { %2151 = vmatprep.subr.bf16.mxu1 %v6073_v45  ;;  %v6163_v45 = vld [vmem:[%s8731_s1 + $0x3dc] ss:$48 sps:$4 sm:$0xff]  }
  0xba   : > { %2394 = vmatpush1.bf16.msra.mxu0 %v6146_v63  ;;  %v6239_v63 = vld [vmem:[%s8733_s3 + $0xc0] ss:$12 sps:$4 sm:$0xff]  }
  0xbb   : > { %2152 = vmatpush1.bf16.msra.mxu1 %v6071_v48  ;;  %2395 = vmatprep.subr.bf16.mxu0 %v6154_v0  ;;  %v6161_v48 = vld [vmem:[%s8731_s1 + $0x3d8] ss:$48 sps:$4 sm:$0xff]  }
  0xbc   : > { %2153 = vmatprep.subr.bf16.mxu1 %v6079_v49  ;;  %v6169_v49 = vld [vmem:[%s8731_s1 + $0x43c] ss:$48 sps:$4 sm:$0xff]  }
  0xbd   : > { %v6247_v0 = vld [vmem:[%s8733_s3 + $0xdc] ss:$12 sps:$4 sm:$0xff]  }
  0xbe   : > { %2396 = vmatpush1.bf16.msra.mxu0 %v6152_v4  ;;  %v6245_v4 = vld [vmem:[%s8733_s3 + $0xd8] ss:$12 sps:$4 sm:$0xff]  }
  0xbf   : > { %2154 = vmatpush1.bf16.msra.mxu1 %v6077_v52  ;;  %2397 = vmatprep.subr.bf16.mxu0 %v6160_v5  ;;  %v6167_v52 = vld [vmem:[%s8731_s1 + $0x438] ss:$48 sps:$4 sm:$0xff]   ;;  %v6253_v5 = vld [vmem:[%s8733_s3 + $0xf4] ss:$12 sps:$4 sm:$0xff]  }
  0xc0   : > { %2155 = vmatprep.subr.bf16.mxu1 %v6085_v53  ;;  %v6175_v53 = vld [vmem:[%s8731_s1 + $0x49c] ss:$48 sps:$4 sm:$0xff]  }
  0xc2   : > { %2398 = vmatpush1.bf16.msra.mxu0 %v6158_v8  ;;  %v6251_v8 = vld [vmem:[%s8733_s3 + $0xf0] ss:$12 sps:$4 sm:$0xff]  }
  0xc3   : > { %2156 = vmatpush1.bf16.msra.mxu1 %v6083_v56  ;;  %2399 = vmatprep.subr.bf16.mxu0 %v6166_v9  ;;  %v6173_v56 = vld [vmem:[%s8731_s1 + $0x498] ss:$48 sps:$4 sm:$0xff]  }
  0xc4   : > { %2157 = vmatprep.subr.bf16.mxu1 %v6091_v57  ;;  %v6181_v57 = vld [vmem:[%s8731_s1 + $0x4fc] ss:$48 sps:$4 sm:$0xff]  }
  0xc5   : > { %v6259_v9 = vld [vmem:[%s8733_s3 + $0x10c] ss:$12 sps:$4 sm:$0xff]  }
  0xc6   : > { %2400 = vmatpush1.bf16.msra.mxu0 %v6164_v12  ;;  %v6257_v12 = vld [vmem:[%s8733_s3 + $0x108] ss:$12 sps:$4 sm:$0xff]  }
  0xc7   : > { %2158 = vmatpush1.bf16.msra.mxu1 %v6089_v61  ;;  %2401 = vmatprep.subr.bf16.mxu0 %v6172_v13  ;;  %v6179_v61 = vld [vmem:[%s8731_s1 + $0x4f8] ss:$48 sps:$4 sm:$0xff]   ;;  %v6265_v13 = vld [vmem:[%s8733_s3 + $0x124] ss:$12 sps:$4 sm:$0xff]  }
  0xc8   : > { %2159 = vmatprep.subr.bf16.mxu1 %v6097_v62  ;;  %v6187_v62 = vld [vmem:[%s8731_s1 + $0x55c] ss:$48 sps:$4 sm:$0xff]  }
  0xca   : > { %2402 = vmatpush1.bf16.msra.mxu0 %v6170_v16  ;;  %v6263_v16 = vld [vmem:[%s8733_s3 + $0x120] ss:$12 sps:$4 sm:$0xff]  }
  0xcb   : > { %2160 = vmatpush1.bf16.msra.mxu1 %v6095_v2  ;;  %2403 = vmatprep.subr.bf16.mxu0 %v6178_v17  ;;  %v6185_v2 = vld [vmem:[%s8731_s1 + $0x558] ss:$48 sps:$4 sm:$0xff]  }
  0xcc   : > { %2268 = vmatprep.subr.bf16.mxu1 %v6103_v3  ;;  %v6190_v3 = vld [vmem:[%s8731_s1 + $0x5bc] ss:$48 sps:$4 sm:$0xff]  }
  0xcd   : > { %v6271_v17 = vld [vmem:[%s8733_s3 + $0x13c] ss:$12 sps:$4 sm:$0xff]  }
  0xce   : > { %2178 = vmatmul.mubr.bf16.vlgmr.msra.gmra.mrb[4].mxu1 %v7100_v31  ;;  %2404 = vmatpush1.bf16.msra.mxu0 %v6176_v20  ;;  %v6269_v20 = vld [vmem:[%s8733_s3 + $0x138] ss:$12 sps:$4 sm:$0xff]  }
  0xcf   : > { %2269 = vmatpush1.bf16.msra.mxu1 %v6101_v6  ;;  %2300 = vmatprep.mubr.bf16.mxu1 %v6884_v21  ;;  %v6188_v6 = vld [vmem:[%s8731_s1 + $0x5b8] ss:$48 sps:$4 sm:$0xff]  }
  0xd0   : > { %2270 = vmatprep.subr.bf16.mxu1 %v6109_v7  ;;  %2405 = vmatprep.subr.bf16.mxu0 %v6184_v22  ;;  %v6196_v7 = vld [vmem:[%s8731_s1 + $0x61c] ss:$48 sps:$4 sm:$0xff]   ;;  %v6277_v22 = vld [vmem:[%s8733_s3 + $0x154] ss:$12 sps:$4 sm:$0xff]  }
  0xd2   : > { %2406 = vmatpush1.bf16.msra.mxu0 %v6182_v25  ;;  %v6275_v25 = vld [vmem:[%s8733_s3 + $0x150] ss:$12 sps:$4 sm:$0xff]  }
  0xd3   : > { %2271 = vmatpush1.bf16.msra.mxu1 %v6107_v10  ;;  %4475 = vmatprep.subr.bf16.mxu0 %v6193_v26  ;;  %v6194_v10 = vld [vmem:[%s8731_s1 + $0x618] ss:$48 sps:$4 sm:$0xff]  }
  0xd4   : > { %2272 = vmatprep.subr.bf16.mxu1 %v6115_v11  ;;  %v6202_v11 = vld [vmem:[%s8731_s1 + $0x67c] ss:$48 sps:$4 sm:$0xff]  }
  0xd5   : > { %2424 = vmatmul.mubr.bf16.vlgmr.msra.gmra.mrb[4].mxu0 %v7100_v31  ;;  %v6283_v26 = vld [vmem:[%s8733_s3 + $0x16c] ss:$12 sps:$4 sm:$0xff]  }
  0xd6   : > { %4476 = vmatpush1.bf16.msra.mxu0 %v6191_v29  ;;  %v6281_v29 = vld [vmem:[%s8733_s3 + $0x168] ss:$12 sps:$4 sm:$0xff]  }
  0xd7   : > { %2273 = vmatpush1.bf16.msra.mxu1 %v6113_v14  ;;  %4477 = vmatprep.subr.bf16.mxu0 %v6199_v30  ;;  %v6200_v14 = vld [vmem:[%s8731_s1 + $0x678] ss:$48 sps:$4 sm:$0xff]   ;;  %v6310_v30 = vld [vmem:[%s8733_s3 + $0x184] ss:$12 sps:$4 sm:$0xff]  }
  0xd8   : > { %2274 = vmatprep.subr.bf16.mxu1 %v6121_v15  ;;  %v6208_v15 = vld [vmem:[%s8731_s1 + $0x6dc] ss:$48 sps:$4 sm:$0xff]  }
  0xda   : > { %4478 = vmatpush1.bf16.msra.mxu0 %v6197_v34  ;;  %v6230_v34 = vld [vmem:[%s8731_s1 + $0x858] ss:$48 sps:$4 sm:$0xff]  }
  0xdb   : > { %2275 = vmatpush1.bf16.msra.mxu1 %v6119_v18  ;;  %4479 = vmatprep.subr.bf16.mxu0 %v6205_v35  ;;  %v6206_v18 = vld [vmem:[%s8731_s1 + $0x6d8] ss:$48 sps:$4 sm:$0xff]   ;;  %v6238_v35 = vld [vmem:[%s8731_s1 + $0x8bc] ss:$48 sps:$4 sm:$0xff]  }
  0xdc   : > { %2276 = vmatprep.subr.bf16.mxu1 %v6127_v19  ;;  %v6214_v19 = vld [vmem:[%s8731_s1 + $0x73c] ss:$48 sps:$4 sm:$0xff]  }
  0xde   : > { %4480 = vmatpush1.bf16.msra.mxu0 %v6203_v38  ;;  %v6242_v38 = vld [vmem:[%s8731_s1 + $0x28] ss:$48 sps:$4 sm:$0xff]  }
  0xdf   : > { %2277 = vmatpush1.bf16.msra.mxu1 %v6125_v23  ;;  %4481 = vmatprep.subr.bf16.mxu0 %v6211_v39  ;;  %v6212_v23 = vld [vmem:[%s8731_s1 + $0x738] ss:$48 sps:$4 sm:$0xff]   ;;  %v6250_v39 = vld [vmem:[%s8731_s1 + $0x8c] ss:$48 sps:$4 sm:$0xff]  }
  0xe0   : > { %2278 = vmatprep.subr.bf16.mxu1 %v6133_v24  ;;  %v6220_v24 = vld [vmem:[%s8731_s1 + $0x79c] ss:$48 sps:$4 sm:$0xff]  }
  0xe2   : > { %4482 = vmatpush1.bf16.msra.mxu0 %v6209_v42  ;;  %v522_v42 = vlaneseq }
  0xe3   : > { %2279 = vmatpush1.bf16.msra.mxu1 %v6131_v27  ;;  %4483 = vmatprep.subr.bf16.mxu0 %v6217_v43  ;;  %v6218_v27 = vld [vmem:[%s8731_s1 + $0x798] ss:$48 sps:$4 sm:$0xff]  }
  0xe4   : > { %2280 = vmatprep.subr.bf16.mxu1 %v6139_v28  ;;  %v6226_v28 = vld [vmem:[%s8731_s1 + $0x7fc] ss:$48 sps:$4 sm:$0xff]   ;;  %v6254_v43 = vld [vmem:[%s8731_s1 + $0xe8] ss:$48 sps:$4 sm:$0xff]  }
  0xe6   : > { %4484 = vmatpush1.bf16.msra.mxu0 %v6215_v46  ;;  %v6268_v46 = vld [vmem:[%s8731_s1 + $0x1ac] ss:$48 sps:$4 sm:$0xff]  }
  0xe7   : > { %2281 = vmatpush1.bf16.msra.mxu1 %v6137_v32  ;;  %4485 = vmatprep.subr.bf16.mxu0 %v6223_v47  ;;  %v6224_v32 = vld [vmem:[%s8731_s1 + $0x7f8] ss:$48 sps:$4 sm:$0xff]  }
  0xe8   : > { %2282 = vmatprep.subr.bf16.mxu1 %v6145_v33  ;;  %v6232_v33 = vld [vmem:[%s8731_s1 + $0x85c] ss:$48 sps:$4 sm:$0xff]   ;;  %v6266_v47 = vld [vmem:[%s8731_s1 + $0x1a8] ss:$48 sps:$4 sm:$0xff]  }
  0xea   : > { %4486 = vmatpush1.bf16.msra.mxu0 %v6221_v50 }
  0xeb   : > { %2283 = vmatpush1.bf16.msra.mxu1 %v6143_v36  ;;  %4487 = vmatprep.subr.bf16.mxu0 %v6229_v51  ;;  %v6236_v36 = vld [vmem:[%s8731_s1 + $0x8b8] ss:$48 sps:$4 sm:$0xff]   ;;  %v6274_v51 = vld [vmem:[%s8731_s1 + $0x20c] ss:$48 sps:$4 sm:$0xff]  }
  0xec   : > { %2284 = vmatprep.subr.bf16.mxu1 %v6151_v37  ;;  %v6244_v37 = vld [vmem:[%s8731_s1 + $0x2c] ss:$48 sps:$4 sm:$0xff]  }
  0xee   : > { %4488 = vmatpush1.bf16.msra.mxu0 %v6227_v54 }
  0xef   : > { %2285 = vmatpush1.bf16.msra.mxu1 %v6149_v40  ;;  %4489 = vmatprep.subr.bf16.mxu0 %v6235_v55  ;;  %v6248_v40 = vld [vmem:[%s8731_s1 + $0x88] ss:$48 sps:$4 sm:$0xff]   ;;  %v6280_v55 = vld [vmem:[%s8731_s1 + $0x26c] ss:$48 sps:$4 sm:$0xff]  }
  0xf0   : > { %2286 = vmatprep.subr.bf16.mxu1 %v6157_v41  ;;  %v6256_v41 = vld [vmem:[%s8731_s1 + $0xec] ss:$48 sps:$4 sm:$0xff]  }
  0xf2   : > { %4490 = vmatpush1.bf16.msra.mxu0 %v6233_v58 }
  0xf3   : > { %2287 = vmatpush1.bf16.msra.mxu1 %v6155_v44  ;;  %4491 = vmatprep.subr.bf16.mxu0 %v6241_v60  ;;  %v6262_v44 = vld [vmem:[%s8731_s1 + $0x14c] ss:$48 sps:$4 sm:$0xff]   ;;  %v6278_v60 = vld [vmem:[%s8731_s1 + $0x268] ss:$48 sps:$4 sm:$0xff]  }
  0xf4   : > { %2288 = vmatprep.subr.bf16.mxu1 %v6163_v45  ;;  %v7693_v45 = vshrl.u32 %v522_v42, 7  ;;  %v6313_v42 = vld [vmem:[%s8731_s1 + $0x5cc] ss:$48 sps:$4 sm:$0xff]  }
  0xf6   : > { %4492 = vmatpush1.bf16.msra.mxu0 %v6239_v63  ;;  %v7713_v50 = vsub.s32 1, %v7693_v45 }
  0xf7   : > { %2289 = vmatpush1.bf16.msra.mxu1 %v6161_v48  ;;  %4493 = vmatprep.subr.bf16.mxu0 %v6247_v0  ;;  %v7707_v48 = vld [vmem:[%s8732_s2] sm:$0xff] }
  0xf8   : > { %2290 = vmatprep.subr.bf16.mxu1 %v6169_v49  ;;  %v7710_v49 = vsub.s32 0, %v7693_v45  ;;  %v529_v54 = vrot.slane %v7707_v48, %v7713_v50 }
  0xfa   : > { %4494 = vmatpush1.bf16.msra.mxu0 %v6245_v4  ;;  %v6284_v4 = vld [vmem:[%s8731_s1 + $0x2c8] ss:$48 sps:$4 sm:$0xff]  }
  0xfb   : > { %2291 = vmatpush1.bf16.msra.mxu1 %v6167_v52  ;;  %4495 = vmatprep.subr.bf16.mxu0 %v6253_v5  ;;  %v525_v52 = vrot.slane %v7707_v48, %v7710_v49  ;;  %v6308_v5 = vld [vmem:[%s8733_s3 + $0x180] ss:$12 sps:$4 sm:$0xff]  }
  0xfc   : > { %2292 = vmatprep.subr.bf16.mxu1 %v6175_v53  ;;  %v6272_v53 = vld [vmem:[%s8731_s1 + $0x208] ss:$48 sps:$4 sm:$0xff]  }
  0xfe   : > { %4496 = vmatpush1.bf16.msra.mxu0 %v6251_v8  ;;  %v6289_v8 = vld [vmem:[%s8731_s1 + $0x32c] ss:$48 sps:$4 sm:$0xff]  }
  0xff   : > { %2293 = vmatpush1.bf16.msra.mxu1 %v6173_v56  ;;  %4497 = vmatprep.subr.bf16.mxu0 %v6259_v9  ;;  %v6316_v9 = vld [vmem:[%s8733_s3 + $0x19c] ss:$12 sps:$4 sm:$0xff]  }
 0x100   : > { %2294 = vmatprep.subr.bf16.mxu1 %v6181_v57 }
 0x102   : > { %4498 = vmatpush1.bf16.msra.mxu0 %v6257_v12  ;;  %v6292_v12 = vld [vmem:[%s8731_s1 + $0x38c] ss:$48 sps:$4 sm:$0xff]  }
 0x103   : > { %2295 = vmatpush1.bf16.msra.mxu1 %v6179_v61  ;;  %4499 = vmatprep.subr.bf16.mxu0 %v6265_v13  ;;  %v6322_v13 = vld [vmem:[%s8733_s3 + $0x1b4] ss:$12 sps:$4 sm:$0xff]  }
 0x104   : > { %2296 = vmatprep.subr.bf16.mxu1 %v6187_v62 }
 0x106   : > { %4500 = vmatpush1.bf16.msra.mxu0 %v6263_v16  ;;  %v6295_v16 = vld [vmem:[%s8731_s1 + $0x3ec] ss:$48 sps:$4 sm:$0xff]  }
 0x107   : > { %2297 = vmatpush1.bf16.msra.mxu1 %v6185_v2  ;;  %4501 = vmatprep.subr.bf16.mxu0 %v6271_v17  ;;  %v6286_v2 = vld [vmem:[%s8731_s1 + $0x2cc] ss:$48 sps:$4 sm:$0xff]  }
 0x108   : > { %2298 = vmatprep.subr.bf16.mxu1 %v6190_v3  ;;  %v6328_v17 = vld [vmem:[%s8733_s3 + $0x1cc] ss:$12 sps:$4 sm:$0xff]  }
 0x10a   : > { %4502 = vmatpush1.bf16.msra.mxu0 %v6269_v20  ;;  %v6298_v20 = vld [vmem:[%s8731_s1 + $0x44c] ss:$48 sps:$4 sm:$0xff]  }
 0x10b   : > { %2299 = vmatpush1.bf16.msra.mxu1 %v6188_v6  ;;  %4503 = vmatprep.subr.bf16.mxu0 %v6277_v22  ;;  %v6334_v22 = vld [vmem:[%s8733_s3 + $0x1e4] ss:$12 sps:$4 sm:$0xff]  }
 0x10c   : > { %2309 = vmatprep.subr.bf16.mxu1 %v6196_v7 }
 0x10e   : > { %2301 = vmatmul.mubr.bf16.vlgmr.msra.gmra.mrb[8].mxu1 %v6997_v59  ;;  %4504 = vmatpush1.bf16.msra.mxu0 %v6275_v25 }
 0x10f   : > { %2310 = vmatpush1.bf16.msra.mxu1 %v6194_v10  ;;  %2341 = vmatprep.mubr.bf16.mxu1 %v6736_v1  ;;  %v6287_v10 = vld [vmem:[%s8731_s1 + $0x328] ss:$48 sps:$4 sm:$0xff]  }
 0x110   : > { %2311 = vmatprep.subr.bf16.mxu1 %v6202_v11  ;;  %4505 = vmatprep.subr.bf16.mxu0 %v6283_v26  ;;  %v6314_v11 = vld [vmem:[%s8733_s3 + $0x198] ss:$12 sps:$4 sm:$0xff]  }
 0x112   : > { %4506 = vmatpush1.bf16.msra.mxu0 %v6281_v29  ;;  %v6340_v29 = vld [vmem:[%s8733_s3 + $0x1fc] ss:$12 sps:$4 sm:$0xff]  }
 0x113   : > { %2312 = vmatpush1.bf16.msra.mxu1 %v6200_v14  ;;  %4516 = vmatprep.subr.bf16.mxu0 %v6310_v30  ;;  %v6290_v14 = vld [vmem:[%s8731_s1 + $0x388] ss:$48 sps:$4 sm:$0xff]  }
 0x114   : > { %2313 = vmatprep.subr.bf16.mxu1 %v6208_v15  ;;  %v6320_v15 = vld [vmem:[%s8733_s3 + $0x1b0] ss:$12 sps:$4 sm:$0xff]   ;;  %v6299_v30 = vld [vmem:[%s8731_s1 + $0x4a8] ss:$48 sps:$4 sm:$0xff]  }
 0x117   : > { %2314 = vmatpush1.bf16.msra.mxu1 %v6206_v18  ;;  %v6293_v18 = vld [vmem:[%s8731_s1 + $0x3e8] ss:$48 sps:$4 sm:$0xff]  }
 0x118   : > { %2315 = vmatprep.subr.bf16.mxu1 %v6214_v19  ;;  %v6326_v19 = vld [vmem:[%s8733_s3 + $0x1c8] ss:$12 sps:$4 sm:$0xff]  }
 0x11b   : > { %2316 = vmatpush1.bf16.msra.mxu1 %v6212_v23  ;;  %v6296_v23 = vld [vmem:[%s8731_s1 + $0x448] ss:$48 sps:$4 sm:$0xff]  }
 0x11c   : > { %2317 = vmatprep.subr.bf16.mxu1 %v6220_v24  ;;  %v6332_v24 = vld [vmem:[%s8733_s3 + $0x1e0] ss:$12 sps:$4 sm:$0xff]  }
 0x11f   : > { %2318 = vmatpush1.bf16.msra.mxu1 %v6218_v27  ;;  %v6301_v27 = vld [vmem:[%s8731_s1 + $0x4ac] ss:$48 sps:$4 sm:$0xff]  }
 0x120   : > { %2319 = vmatprep.subr.bf16.mxu1 %v6226_v28 }
 0x123   : > { %2320 = vmatpush1.bf16.msra.mxu1 %v6224_v32 }
 0x124   : > { %2321 = vmatprep.subr.bf16.mxu1 %v6232_v33  ;;  %v6338_v33 = vld [vmem:[%s8733_s3 + $0x1f8] ss:$12 sps:$4 sm:$0xff]  }
 0x127   : > { %2322 = vmatpush1.bf16.msra.mxu1 %v6230_v34  ;;  %v6304_v34 = vld [vmem:[%s8731_s1 + $0x50c] ss:$48 sps:$4 sm:$0xff]  }
 0x128   : > { %2323 = vmatprep.subr.bf16.mxu1 %v6238_v35  ;;  %v6346_v35 = vld [vmem:[%s8733_s3 + $0x214] ss:$12 sps:$4 sm:$0xff]  }
 0x12b   : > { %2324 = vmatpush1.bf16.msra.mxu1 %v6236_v36  ;;  %v6302_v36 = vld [vmem:[%s8731_s1 + $0x508] ss:$48 sps:$4 sm:$0xff]  }
 0x12c   : > { %2432 = vmatprep.subr.bf16.mxu1 %v6244_v37  ;;  %v6344_v37 = vld [vmem:[%s8733_s3 + $0x210] ss:$12 sps:$4 sm:$0xff]  }
 0x12e   : > { %2342 = vmatmul.mubr.bf16.vlgmr.msra.gmra.mrb[8].mxu1 %v7100_v31 }
 0x12f   : > { %2433 = vmatpush1.bf16.msra.mxu1 %v6242_v38  ;;  %2464 = vmatprep.mubr.bf16.mxu1 %v6884_v21  ;;  %v6260_v21 = vld [vmem:[%s8731_s1 + $0x148] ss:$48 sps:$4 sm:$0xff]   ;;  %v6307_v38 = vld [vmem:[%s8731_s1 + $0x56c] ss:$48 sps:$4 sm:$0xff]  }
 0x130   : > { %2434 = vmatprep.subr.bf16.mxu1 %v6250_v39  ;;  %v6352_v39 = vld [vmem:[%s8733_s3 + $0x22c] ss:$12 sps:$4 sm:$0xff]  }
 0x133   : > { %2435 = vmatpush1.bf16.msra.mxu1 %v6248_v40  ;;  %v6305_v40 = vld [vmem:[%s8731_s1 + $0x568] ss:$48 sps:$4 sm:$0xff]  }
 0x134   : > { %2436 = vmatprep.subr.bf16.mxu1 %v6256_v41  ;;  %v6350_v41 = vld [vmem:[%s8733_s3 + $0x228] ss:$12 sps:$4 sm:$0xff]  }
 0x137   : > { %2437 = vmatpush1.bf16.msra.mxu1 %v6254_v43  ;;  %v6358_v43 = vld [vmem:[%s8733_s3 + $0x244] ss:$12 sps:$4 sm:$0xff]  }
 0x138   : > { %2438 = vmatprep.subr.bf16.mxu1 %v6262_v44  ;;  %v6311_v44 = vld [vmem:[%s8731_s1 + $0x5c8] ss:$48 sps:$4 sm:$0xff]  }
 0x13b   : > { %2439 = vmatpush1.bf16.msra.mxu1 %v6260_v21  ;;  %v6319_v21 = vld [vmem:[%s8731_s1 + $0x62c] ss:$48 sps:$4 sm:$0xff]  }
 0x13c   : > { %2440 = vmatprep.subr.bf16.mxu1 %v6268_v46  ;;  %v6356_v46 = vld [vmem:[%s8733_s3 + $0x240] ss:$12 sps:$4 sm:$0xff]  }
 0x13f   : > { %2441 = vmatpush1.bf16.msra.mxu1 %v6266_v47  ;;  %v6364_v47 = vld [vmem:[%s8733_s3 + $0x25c] ss:$12 sps:$4 sm:$0xff]  }
 0x140   : > { %2442 = vmatprep.subr.bf16.mxu1 %v6274_v51  ;;  %v6317_v51 = vld [vmem:[%s8731_s1 + $0x628] ss:$48 sps:$4 sm:$0xff]  }
 0x141   : > { %v2097_v56 = vpop.f32.mrb[0].mxu1 }
 0x142   : > { %v5754_v57 = vadd.f32 %v2097_v56, %v525_v52  ;;  %v2099_v58 = vpop.f32.mrb[1].mxu1  ;;  %v6325_v52 = vld [vmem:[%s8731_s1 + $0x68c] ss:$48 sps:$4 sm:$0xff]  }
 0x143   : > { %v5755_v61 = vadd.f32 %v2099_v58, %v529_v54  ;;  %v2101_v62 = vpop.f32.mrb[2].mxu1  ;;  %2443 = vmatpush1.bf16.msra.mxu1 %v6272_v53  ;;  %v6362_v53 = vld [vmem:[%s8733_s3 + $0x258] ss:$12 sps:$4 sm:$0xff]   ;;  %v6369_v54 = vld [vmem:[%s8733_s3 + $0x274] ss:$12 sps:$4 sm:$0xff]  }
 0x144   : > { %v2514_v63 = vmax.f32 %v5754_v57, 0.0  ;;  %v2102_v0 = vpop.f32.mrb[3].mxu1  ;;  %2444 = vmatprep.subr.bf16.mxu1 %v6280_v55  ;;  %v6323_v55 = vld [vmem:[%s8731_s1 + $0x688] ss:$48 sps:$4 sm:$0xff]   ;;  %v6331_v56 = vld [vmem:[%s8731_s1 + $0x6ec] ss:$48 sps:$4 sm:$0xff]  }
 0x145   : > { %v2515_v3 = vmax.f32 %v5755_v61, 0.0  ;;  %v6367_v57 = vld [vmem:[%s8733_s3 + $0x270] ss:$12 sps:$4 sm:$0xff]   ;;  %v6329_v58 = vld [vmem:[%s8731_s1 + $0x6e8] ss:$48 sps:$4 sm:$0xff]  }
 0x146   : > { %v7742_v7 = vpack.c.bf16 %v2514_v63, %v2514_v63  ;;  %v6379_v61 = vld [vmem:[%s8733_s3 + $0x2a4] ss:$12 sps:$4 sm:$0xff]   ;;  %v6335_v62 = vld [vmem:[%s8731_s1 + $0x748] ss:$48 sps:$4 sm:$0xff]   ;;  %v6343_v63 = vld [vmem:[%s8731_s1 + $0x7ac] ss:$48 sps:$4 sm:$0xff]  }
 0x147   : > { %v7740_v6 = vpack.c.bf16 %v2515_v3, %v2515_v3  ;;  %2445 = vmatpush1.bf16.msra.mxu1 %v6278_v60  ;;  %v6372_v60 = vld [vmem:[%s8733_s3 + $0x288] ss:$12 sps:$4 sm:$0xff]   ;;  %v6377_v0 = vld [vmem:[%s8733_s3 + $0x2a0] ss:$12 sps:$4 sm:$0xff]  }
 0x148   : > { %2446 = vmatprep.subr.bf16.mxu1 %v6286_v2  ;;  %v7794_v25 = vpop.f32.mrb[0].mxu0  ;;  %v6384_v2 = vld [vmem:[%s8733_s3 + $0x2bc] ss:$12 sps:$4 sm:$0xff]  }
 0x149   : > { %4507 = vmatprep.mubr.bf16.mxu0 %v7740_v6  ;;  %v7796_v26 = vpop.f32.mrb[1].mxu0  ;;  %v6341_v3 = vld [vmem:[%s8731_s1 + $0x7a8] ss:$48 sps:$4 sm:$0xff]  }
 0x14a   : > { %4508 = vmatmul.mubr.bf16.vlgmr.msra.gmra.mrb[8].mxu0 %v7742_v7  ;;  %v2265_v28 = vpop.f32.mrb[2].mxu0 }
 0x14b   : > { %2447 = vmatpush1.bf16.msra.mxu1 %v6284_v4  ;;  %4517 = vmatpush1.bf16.msra.mxu0 %v6308_v5  ;;  %v2266_v32 = vpop.f32.mrb[3].mxu0  ;;  %v6349_v4 = vld [vmem:[%s8731_s1 + $0x80c] ss:$48 sps:$4 sm:$0xff]   ;;  %v6382_v5 = vld [vmem:[%s8733_s3 + $0x2b8] ss:$12 sps:$4 sm:$0xff]   ;;  %v544_v28 = vsub.s32 5, %v7693_v45 }
 0x14c   : > { %2448 = vmatprep.subr.bf16.mxu1 %v6289_v8  ;;  %4518 = vmatprep.subr.bf16.mxu0 %v6316_v9  ;;  %v6347_v8 = vld [vmem:[%s8731_s1 + $0x808] ss:$48 sps:$4 sm:$0xff]   ;;  %v6389_v9 = vld [vmem:[%s8733_s3 + $0x2d4] ss:$12 sps:$4 sm:$0xff]   ;;  %v536_v32 = vsub.s32 3, %v7693_v45 }
 0x14f   : > { %2449 = vmatpush1.bf16.msra.mxu1 %v6287_v10  ;;  %4519 = vmatpush1.bf16.msra.mxu0 %v6314_v11  ;;  %v6355_v10 = vld [vmem:[%s8731_s1 + $0x86c] ss:$48 sps:$4 sm:$0xff]  }
 0x150   : > { %2450 = vmatprep.subr.bf16.mxu1 %v6292_v12  ;;  %4520 = vmatprep.subr.bf16.mxu0 %v6322_v13  ;;  %v6387_v11 = vld [vmem:[%s8733_s3 + $0x2d0] ss:$12 sps:$4 sm:$0xff]   ;;  %v6353_v12 = vld [vmem:[%s8731_s1 + $0x868] ss:$48 sps:$4 sm:$0xff]  }
 0x151   : > { %v6394_v13 = vld [vmem:[%s8733_s3 + $0x2ec] ss:$12 sps:$4 sm:$0xff]  }
 0x153   : > { %2451 = vmatpush1.bf16.msra.mxu1 %v6290_v14  ;;  %4521 = vmatpush1.bf16.msra.mxu0 %v6320_v15  ;;  %v6361_v14 = vld [vmem:[%s8731_s1 + $0x8cc] ss:$48 sps:$4 sm:$0xff]   ;;  %v6392_v15 = vld [vmem:[%s8733_s3 + $0x2e8] ss:$12 sps:$4 sm:$0xff]  }
 0x154   : > { %2452 = vmatprep.subr.bf16.mxu1 %v6295_v16  ;;  %4522 = vmatprep.subr.bf16.mxu0 %v6328_v17  ;;  %v6399_v16 = vld [vmem:[%s8733_s3 + $0x304] ss:$12 sps:$4 sm:$0xff]   ;;  %v6359_v17 = vld [vmem:[%s8731_s1 + $0x8c8] ss:$48 sps:$4 sm:$0xff]  }
 0x157   : > { %2453 = vmatpush1.bf16.msra.mxu1 %v6293_v18  ;;  %4523 = vmatpush1.bf16.msra.mxu0 %v6326_v19  ;;  %v6365_v18 = vld [vmem:[%s8733_s3 + $0xc8] ss:$12 sps:$4 sm:$0xff]  }
 0x158   : > { %2454 = vmatprep.subr.bf16.mxu1 %v6298_v20  ;;  %4524 = vmatprep.subr.bf16.mxu0 %v6334_v22  ;;  %v6366_v19 = vld [vmem:[%s8733_s3 + $0x8] ss:$12 sps:$4 sm:$0xff]   ;;  %v6370_v20 = vld [vmem:[%s8733_s3 + $0xe0] ss:$12 sps:$4 sm:$0xff]  }
 0x159   : > { %v6371_v22 = vld [vmem:[%s8733_s3 + $0x20] ss:$12 sps:$4 sm:$0xff]  }
 0x15b   : > { %2455 = vmatpush1.bf16.msra.mxu1 %v6296_v23  ;;  %4525 = vmatpush1.bf16.msra.mxu0 %v6332_v24  ;;  %v6375_v23 = vld [vmem:[%s8733_s3 + $0xf8] ss:$12 sps:$4 sm:$0xff]  }
 0x15c   : > { %2456 = vmatprep.subr.bf16.mxu1 %v6301_v27  ;;  %4526 = vmatprep.subr.bf16.mxu0 %v6340_v29  ;;  %v6376_v24 = vld [vmem:[%s8733_s3 + $0x38] ss:$12 sps:$4 sm:$0xff]   ;;  %v6385_v27 = vld [vmem:[%s8733_s3 + $0x128] ss:$12 sps:$4 sm:$0xff]   ;;  %v7972_v29 = vsub.s32 2, %v7693_v45 }
 0x15f   : > { %2457 = vmatpush1.bf16.msra.mxu1 %v6299_v30  ;;  %4527 = vmatpush1.bf16.msra.mxu0 %v6338_v33  ;;  %v6386_v30 = vld [vmem:[%s8733_s3 + $0x68] ss:$12 sps:$4 sm:$0xff]   ;;  %v6390_v33 = vld [vmem:[%s8733_s3 + $0x140] ss:$12 sps:$4 sm:$0xff]  }
 0x160   : > { %2458 = vmatprep.subr.bf16.mxu1 %v6304_v34  ;;  %4528 = vmatprep.subr.bf16.mxu0 %v6346_v35  ;;  %v545_v34 = vrot.slane %v7707_v48, %v544_v28  ;;  %v533_v35 = vrot.slane %v7707_v48, %v7972_v29  ;;  %v6439_v28 = vld [vmem:[%s8733_s3 + $0x3c4] ss:$12 sps:$4 sm:$0xff]  }
 0x163   : > { %2459 = vmatpush1.bf16.msra.mxu1 %v6302_v36  ;;  %4529 = vmatpush1.bf16.msra.mxu0 %v6344_v37  ;;  %v537_v36 = vrot.slane %v7707_v48, %v536_v32  ;;  %v6391_v37 = vld [vmem:[%s8733_s3 + $0x80] ss:$12 sps:$4 sm:$0xff]  }
 0x164   : > { %2460 = vmatprep.subr.bf16.mxu1 %v6307_v38  ;;  %4530 = vmatprep.subr.bf16.mxu0 %v6352_v39  ;;  %v6395_v38 = vld [vmem:[%s8733_s3 + $0x158] ss:$12 sps:$4 sm:$0xff]   ;;  %v5759_v39 = vadd.f32 %v7796_v26, %v545_v34  ;;  %v6441_v34 = vld [vmem:[%s8733_s3 + $0x230] ss:$12 sps:$4 sm:$0xff]  }
 0x167   : > { %2461 = vmatpush1.bf16.msra.mxu1 %v6305_v40  ;;  %4531 = vmatpush1.bf16.msra.mxu0 %v6350_v41 }
 0x168   : > { %2462 = vmatprep.subr.bf16.mxu1 %v6313_v42  ;;  %4532 = vmatprep.subr.bf16.mxu0 %v6358_v43 }
 0x16b   : > { %2463 = vmatpush1.bf16.msra.mxu1 %v6311_v44  ;;  %4533 = vmatpush1.bf16.msra.mxu0 %v6356_v46 }
 0x16c   : > { %2473 = vmatprep.subr.bf16.mxu1 %v6319_v21  ;;  %4534 = vmatprep.subr.bf16.mxu0 %v6364_v47  ;;  %v6396_v21 = vld [vmem:[%s8733_s3 + $0x98] ss:$12 sps:$4 sm:$0xff]  }
 0x16e   : > { %2465 = vmatmul.mubr.bf16.vlgmr.msra.gmra.mrb[12].mxu1 %v6997_v59  ;;  %v6374_v59 = vld [vmem:[%s8733_s3 + $0x28c] ss:$12 sps:$4 sm:$0xff]  }
 0x16f   : > { %2474 = vmatpush1.bf16.msra.mxu1 %v6317_v51  ;;  %2505 = vmatprep.mubr.bf16.mxu1 %v6736_v1  ;;  %v6337_v1 = vld [vmem:[%s8731_s1 + $0x74c] ss:$48 sps:$4 sm:$0xff]  }
 0x170   : > { %2475 = vmatprep.subr.bf16.mxu1 %v6325_v52  ;;  %4535 = vmatpush1.bf16.msra.mxu0 %v6362_v53  ;;  %v6400_v51 = vld [vmem:[%s8733_s3 + $0x170] ss:$12 sps:$4 sm:$0xff]   ;;  %v2519_v52 = vmax.f32 %v5759_v39, 0.0  ;;  %v6449_v39 = vld [vmem:[%s8733_s3 + $0x3f4] ss:$12 sps:$4 sm:$0xff]  }
 0x171   : > { %4536 = vmatprep.subr.bf16.mxu0 %v6369_v54  ;;  %v6397_v54 = vld [vmem:[%s8733_s3 + $0x300] ss:$12 sps:$4 sm:$0xff]  }
 0x173   : > { %2476 = vmatpush1.bf16.msra.mxu1 %v6323_v55 }
 0x174   : > { %2477 = vmatprep.subr.bf16.mxu1 %v6331_v56  ;;  %4537 = vmatpush1.bf16.msra.mxu0 %v6367_v57  ;;  %v6401_v56 = vld [vmem:[%s8733_s3 + $0xb0] ss:$12 sps:$4 sm:$0xff]  }
 0x175   : > { %4538 = vmatprep.subr.bf16.mxu0 %v6374_v59  ;;  %v6404_v57 = vld [vmem:[%s8733_s3 + $0x31c] ss:$12 sps:$4 sm:$0xff]   ;;  %v8011_v59 = vpack.c.bf16 %v2519_v52, %v2519_v52  ;;  %v6457_v52 = vld [vmem:[%s8733_s3 + $0x420] ss:$12 sps:$4 sm:$0xff]  }
 0x177   : > { %2478 = vmatpush1.bf16.msra.mxu1 %v6329_v58  ;;  %v6405_v58 = vld [vmem:[%s8733_s3 + $0x248] ss:$12 sps:$4 sm:$0xff]  }
 0x178   : > { %2479 = vmatprep.subr.bf16.mxu1 %v6337_v1  ;;  %4539 = vmatpush1.bf16.msra.mxu0 %v6372_v60  ;;  %v6402_v1 = vld [vmem:[%s8733_s3 + $0x318] ss:$12 sps:$4 sm:$0xff]   ;;  %v6406_v60 = vld [vmem:[%s8733_s3 + $0x188] ss:$12 sps:$4 sm:$0xff]  }
 0x179   : > { %4540 = vmatprep.subr.bf16.mxu0 %v6379_v61  ;;  %v6409_v61 = vld [vmem:[%s8733_s3 + $0x334] ss:$12 sps:$4 sm:$0xff]  }
 0x17b   : > { %2480 = vmatpush1.bf16.msra.mxu1 %v6335_v62  ;;  %v6410_v62 = vld [vmem:[%s8733_s3 + $0x260] ss:$12 sps:$4 sm:$0xff]  }
 0x17c   : > { %2481 = vmatprep.subr.bf16.mxu1 %v6343_v63  ;;  %4541 = vmatpush1.bf16.msra.mxu0 %v6377_v0  ;;  %v6407_v63 = vld [vmem:[%s8733_s3 + $0x330] ss:$12 sps:$4 sm:$0xff]   ;;  %v6411_v0 = vld [vmem:[%s8733_s3 + $0x1a0] ss:$12 sps:$4 sm:$0xff]  }
 0x17d   : > { %4542 = vmatprep.subr.bf16.mxu0 %v6384_v2  ;;  %v6414_v2 = vld [vmem:[%s8733_s3 + $0x34c] ss:$12 sps:$4 sm:$0xff]  }
 0x17f   : > { %2482 = vmatpush1.bf16.msra.mxu1 %v6341_v3  ;;  %v6412_v3 = vld [vmem:[%s8733_s3 + $0x348] ss:$12 sps:$4 sm:$0xff]  }
 0x180   : > { %2483 = vmatprep.subr.bf16.mxu1 %v6349_v4  ;;  %4543 = vmatpush1.bf16.msra.mxu0 %v6382_v5  ;;  %v6416_v4 = vld [vmem:[%s8733_s3 + $0x1b8] ss:$12 sps:$4 sm:$0xff]  }
 0x181   : > { %4544 = vmatprep.subr.bf16.mxu0 %v6389_v9  ;;  %v6419_v5 = vld [vmem:[%s8733_s3 + $0x364] ss:$12 sps:$4 sm:$0xff]  }
 0x183   : > { %2484 = vmatpush1.bf16.msra.mxu1 %v6347_v8  ;;  %v6420_v8 = vld [vmem:[%s8733_s3 + $0x290] ss:$12 sps:$4 sm:$0xff]  }
 0x184   : > { %2485 = vmatprep.subr.bf16.mxu1 %v6355_v10  ;;  %4545 = vmatpush1.bf16.msra.mxu0 %v6387_v11  ;;  %v6417_v10 = vld [vmem:[%s8733_s3 + $0x360] ss:$12 sps:$4 sm:$0xff]  }
 0x185   : > { %4546 = vmatprep.subr.bf16.mxu0 %v6394_v13  ;;  %v6424_v13 = vld [vmem:[%s8733_s3 + $0x37c] ss:$12 sps:$4 sm:$0xff]  }
 0x187   : > { %2486 = vmatpush1.bf16.msra.mxu1 %v6353_v12  ;;  %v6421_v12 = vld [vmem:[%s8733_s3 + $0x1d0] ss:$12 sps:$4 sm:$0xff]  }
 0x188   : > { %2487 = vmatprep.subr.bf16.mxu1 %v6361_v14  ;;  %4547 = vmatpush1.bf16.msra.mxu0 %v6392_v15  ;;  %v6425_v15 = vld [vmem:[%s8733_s3 + $0x2a8] ss:$12 sps:$4 sm:$0xff]  }
 0x189   : > { %4557 = vmatprep.subr.bf16.mxu0 %v6399_v16 }
 0x18b   : > { %2488 = vmatpush1.bf16.msra.mxu1 %v6359_v17  ;;  %v6422_v17 = vld [vmem:[%s8733_s3 + $0x378] ss:$12 sps:$4 sm:$0xff]  }
 0x18c   : > { %5622 = vmatprep.subr.bf16.mxu1 %v6365_v18  ;;  %v6426_v18 = vld [vmem:[%s8733_s3 + $0x1e8] ss:$12 sps:$4 sm:$0xff]  }
 0x18e   : > { %2506 = vmatmul.mubr.bf16.vlgmr.msra.gmra.mrb[12].mxu1 %v7100_v31  ;;  %v6380_v31 = vld [vmem:[%s8733_s3 + $0x110] ss:$12 sps:$4 sm:$0xff]  }
 0x18f   : > { %5623 = vmatpush3.bf16.msra.mxu1 %v6366_v19  ;;  %4753 = vmatprep.mubr.bf16.mxu1 %v7740_v6  ;;  %v6381_v6 = vld [vmem:[%s8733_s3 + $0x50] ss:$12 sps:$4 sm:$0xff]   ;;  %v6429_v19 = vld [vmem:[%s8733_s3 + $0x394] ss:$12 sps:$4 sm:$0xff]  }
 0x190   : > { %5624 = vmatprep.subr.bf16.mxu1 %v6370_v20  ;;  %v6430_v20 = vld [vmem:[%s8733_s3 + $0x2c0] ss:$12 sps:$4 sm:$0xff]  }
 0x193   : > { %5625 = vmatpush3.bf16.msra.mxu1 %v6371_v22  ;;  %v6427_v22 = vld [vmem:[%s8733_s3 + $0x390] ss:$12 sps:$4 sm:$0xff]  }
 0x194   : > { %5626 = vmatprep.subr.bf16.mxu1 %v6375_v23  ;;  %v6431_v23 = vld [vmem:[%s8733_s3 + $0x200] ss:$12 sps:$4 sm:$0xff]  }
 0x197   : > { %5627 = vmatpush3.bf16.msra.mxu1 %v6376_v24  ;;  %v6434_v24 = vld [vmem:[%s8733_s3 + $0x3ac] ss:$12 sps:$4 sm:$0xff]  }
 0x198   : > { %5628 = vmatprep.subr.bf16.mxu1 %v6380_v31  ;;  %v6435_v31 = vld [vmem:[%s8733_s3 + $0x2d8] ss:$12 sps:$4 sm:$0xff]  }
 0x19b   : > { %5629 = vmatpush3.bf16.msra.mxu1 %v6381_v6  ;;  %v6432_v6 = vld [vmem:[%s8733_s3 + $0x3a8] ss:$12 sps:$4 sm:$0xff]  }
 0x19c   : > { %5630 = vmatprep.subr.bf16.mxu1 %v6385_v27  ;;  %v6436_v27 = vld [vmem:[%s8733_s3 + $0x218] ss:$12 sps:$4 sm:$0xff]  }
 0x19f   : > { %5631 = vmatpush3.bf16.msra.mxu1 %v6386_v30  ;;  %v6440_v30 = vld [vmem:[%s8733_s3 + $0x2f0] ss:$12 sps:$4 sm:$0xff]  }
 0x1a0   : > { %5632 = vmatprep.subr.bf16.mxu1 %v6390_v33  ;;  %v6437_v33 = vld [vmem:[%s8733_s3 + $0x3c0] ss:$12 sps:$4 sm:$0xff]  }
 0x1a1   : > { %v2179_v40 = vpop.f32.mrb[4].mxu1 }
 0x1a2   : > { %v5756_v41 = vadd.f32 %v2179_v40, %v533_v35  ;;  %v2181_v42 = vpop.f32.mrb[5].mxu1  ;;  %v6444_v35 = vld [vmem:[%s8733_s3 + $0x3dc] ss:$12 sps:$4 sm:$0xff]   ;;  %v6450_v40 = vld [vmem:[%s8733_s3 + $0x3e0] ss:$12 sps:$4 sm:$0xff]  }
 0x1a3   : > { %v5757_v43 = vadd.f32 %v2181_v42, %v537_v36  ;;  %v2183_v44 = vpop.f32.mrb[6].mxu1  ;;  %5633 = vmatpush3.bf16.msra.mxu1 %v6391_v37  ;;  %v6445_v36 = vld [vmem:[%s8733_s3 + $0x3c8] ss:$12 sps:$4 sm:$0xff]   ;;  %v6442_v37 = vld [vmem:[%s8733_s3 + $0x3d8] ss:$12 sps:$4 sm:$0xff]  }
 0x1a4   : > { %v2516_v46 = vmax.f32 %v5756_v41, 0.0  ;;  %v2184_v47 = vpop.f32.mrb[7].mxu1  ;;  %5634 = vmatprep.subr.bf16.mxu1 %v6395_v38  ;;  %v6446_v38 = vld [vmem:[%s8733_s3 + $0x308] ss:$12 sps:$4 sm:$0xff]   ;;  %v6447_v41 = vld [vmem:[%s8733_s3 + $0x3f0] ss:$12 sps:$4 sm:$0xff]  }
 0x1a5   : > { %v2517_v53 = vmax.f32 %v5757_v43, 0.0  ;;  %v6451_v42 = vld [vmem:[%s8733_s3 + $0x320] ss:$12 sps:$4 sm:$0xff]   ;;  %v6455_v44 = vld [vmem:[%s8733_s3 + $0x3f8] ss:$12 sps:$4 sm:$0xff]  }
 0x1a6   : > { %v8003_v55 = vpack.c.bf16 %v2516_v46, %v2516_v46  ;;  %v6454_v43 = vld [vmem:[%s8733_s3 + $0x40c] ss:$12 sps:$4 sm:$0xff]   ;;  %v6459_v47 = vld [vmem:[%s8733_s3 + $0x424] ss:$12 sps:$4 sm:$0xff]  }
 0x1a7   : > { %v2529_v26 = vpack.c.bf16 %v2517_v53, %v2517_v53  ;;  %5635 = vmatpush3.bf16.msra.mxu1 %v6396_v21  ;;  %v6452_v21 = vld [vmem:[%s8733_s3 + $0x408] ss:$12 sps:$4 sm:$0xff]   ;;  %v6456_v46 = vld [vmem:[%s8733_s3 + $0x338] ss:$12 sps:$4 sm:$0xff]   ;;  %v540_v53 = vsub.s32 4, %v7693_v45 }
 0x1a8   : > { %5636 = vmatprep.subr.bf16.mxu1 %v6400_v51  ;;  %v8055_v9 = vpop.f32.mrb[4].mxu0  ;;  %v6460_v51 = vld [vmem:[%s8733_s3 + $0x410] ss:$12 sps:$4 sm:$0xff]  }
 0x1a9   : > { %4548 = vmatprep.mubr.bf16.mxu0 %v2529_v26  ;;  %v8060_v11 = vpop.f32.mrb[5].mxu0 }
 0x1aa   : > { %4549 = vmatmul.mubr.bf16.vlgmr.msra.gmra.mrb[8].mxu0 %v8003_v55  ;;  %v2429_v14 = vpop.f32.mrb[6].mxu0 }
 0x1ab   : > { %4558 = vmatpush1.bf16.msra.mxu0 %v6397_v54  ;;  %4589 = vmatprep.mubr.bf16.mxu0 %v8011_v59  ;;  %v2430_v16 = vpop.f32.mrb[7].mxu0  ;;  %v6464_v54 = vld [vmem:[%s8733_s3 + $0x43c] ss:$12 sps:$4 sm:$0xff]  }
 0x1ac   : > { %5637 = vmatpush3.bf16.msra.mxu1 %v6401_v56  ;;  %4559 = vmatprep.subr.bf16.mxu0 %v6404_v57  ;;  %v6462_v56 = vld [vmem:[%s8733_s3 + $0x438] ss:$12 sps:$4 sm:$0xff]   ;;  %v541_v57 = vrot.slane %v7707_v48, %v540_v53  ;;  %v6467_v48 = vld [vmem:[%s8733_s3 + $0x450] ss:$12 sps:$4 sm:$0xff]   ;;  %v6486_v14 = vld [vmem:[%s8733_s3 + $0x488] ss:$12 sps:$4 sm:$0xff]  }
 0x1ad   : > { %5644 = vmatprep.subr.bf16.mxu1 %v6405_v58  ;;  %v6469_v58 = vld [vmem:[%s8733_s3 + $0x454] ss:$12 sps:$4 sm:$0xff]  }
 0x1ae   : > { %v6490_v16 = vld [vmem:[%s8733_s3 + $0x560] ss:$12 sps:$4 sm:$0xff]  }
 0x1af   : > { %4560 = vmatpush1.bf16.msra.mxu0 %v6402_v1  ;;  %4754 = vmatmul.mubr.bf16.vlgmr.msra.gmra.mrb[16].mxu1 %v7742_v7  ;;  %v6415_v7 = vld [vmem:[%s8733_s3 + $0x278] ss:$12 sps:$4 sm:$0xff]   ;;  %v6470_v1 = vld [vmem:[%s8733_s3 + $0x440] ss:$12 sps:$4 sm:$0xff]  }
 0x1b0   : > { %5645 = vmatpush3.bf16.msra.mxu1 %v6406_v60  ;;  %4793 = vmatprep.mubr.bf16.mxu1 %v2529_v26  ;;  %v6461_v26 = vld [vmem:[%s8733_s3 + $0x350] ss:$12 sps:$4 sm:$0xff]   ;;  %v5758_v60 = vadd.f32 %v7794_v25, %v541_v57  ;;  %v6472_v25 = vld [vmem:[%s8733_s3 + $0x468] ss:$12 sps:$4 sm:$0xff]  }
 0x1b1   : > { %4561 = vmatprep.subr.bf16.mxu0 %v6409_v61  ;;  %5646 = vmatprep.subr.bf16.mxu1 %v6410_v62  ;;  %v6471_v61 = vld [vmem:[%s8733_s3 + $0x380] ss:$12 sps:$4 sm:$0xff]   ;;  %v6519_v57 = vld [vmem:[%s8733_s3 + $0x544] ss:$12 sps:$4 sm:$0xff]  }
 0x1b2   : > { %v6474_v62 = vld [vmem:[%s8733_s3 + $0x46c] ss:$12 sps:$4 sm:$0xff]  }
 0x1b3   : > { %4562 = vmatpush1.bf16.msra.mxu0 %v6407_v63  ;;  %v6475_v63 = vld [vmem:[%s8733_s3 + $0x458] ss:$12 sps:$4 sm:$0xff]  }
 0x1b4   : > { %5647 = vmatpush3.bf16.msra.mxu1 %v6411_v0  ;;  %4563 = vmatprep.subr.bf16.mxu0 %v6414_v2  ;;  %v2518_v0 = vmax.f32 %v5758_v60, 0.0  ;;  %v6476_v2 = vld [vmem:[%s8733_s3 + $0x398] ss:$12 sps:$4 sm:$0xff]  }
 0x1b5   : > { %5648 = vmatprep.subr.bf16.mxu1 %v6415_v7  ;;  %v6479_v7 = vld [vmem:[%s8733_s3 + $0x484] ss:$12 sps:$4 sm:$0xff]  }
 0x1b7   : > { %4564 = vmatpush1.bf16.msra.mxu0 %v6412_v3  ;;  %v6480_v3 = vld [vmem:[%s8733_s3 + $0x470] ss:$12 sps:$4 sm:$0xff]  }
 0x1b8   : > { %5649 = vmatpush3.bf16.msra.mxu1 %v6416_v4  ;;  %4565 = vmatprep.subr.bf16.mxu0 %v6419_v5  ;;  %v6477_v4 = vld [vmem:[%s8733_s3 + $0x480] ss:$12 sps:$4 sm:$0xff]   ;;  %v2530_v5 = vpack.c.bf16 %v2518_v0, %v2518_v0 }
 0x1b9   : > { %5650 = vmatprep.subr.bf16.mxu1 %v6420_v8  ;;  %v6481_v8 = vld [vmem:[%s8733_s3 + $0x3b0] ss:$12 sps:$4 sm:$0xff]  }
 0x1bb   : > { %4566 = vmatpush1.bf16.msra.mxu0 %v6417_v10  ;;  %v6484_v10 = vld [vmem:[%s8733_s3 + $0x49c] ss:$12 sps:$4 sm:$0xff]  }
 0x1bc   : > { %5651 = vmatpush3.bf16.msra.mxu1 %v6421_v12  ;;  %4567 = vmatprep.subr.bf16.mxu0 %v6424_v13  ;;  %v6485_v12 = vld [vmem:[%s8733_s3 + $0x548] ss:$12 sps:$4 sm:$0xff]   ;;  %v6482_v13 = vld [vmem:[%s8733_s3 + $0x498] ss:$12 sps:$4 sm:$0xff]  }
 0x1bd   : > { %5652 = vmatprep.subr.bf16.mxu1 %v6425_v15  ;;  %v6489_v15 = vld [vmem:[%s8733_s3 + $0x4b4] ss:$12 sps:$4 sm:$0xff]  }
 0x1bf   : > { %4568 = vmatpush1.bf16.msra.mxu0 %v6422_v17  ;;  %v6487_v17 = vld [vmem:[%s8733_s3 + $0x4b0] ss:$12 sps:$4 sm:$0xff]  }
 0x1c0   : > { %5653 = vmatpush3.bf16.msra.mxu1 %v6426_v18  ;;  %4569 = vmatprep.subr.bf16.mxu0 %v6429_v19  ;;  %v6491_v18 = vld [vmem:[%s8733_s3 + $0x4a0] ss:$12 sps:$4 sm:$0xff]  }
 0x1c1   : > { %5654 = vmatprep.subr.bf16.mxu1 %v6430_v20  ;;  %v6494_v19 = vld [vmem:[%s8733_s3 + $0x4cc] ss:$12 sps:$4 sm:$0xff]  }
 0x1c2   : > { %v6495_v20 = vld [vmem:[%s8733_s3 + $0x578] ss:$12 sps:$4 sm:$0xff]  }
 0x1c3   : > { %4570 = vmatpush1.bf16.msra.mxu0 %v6427_v22  ;;  %v6492_v22 = vld [vmem:[%s8733_s3 + $0x4c8] ss:$12 sps:$4 sm:$0xff]  }
 0x1c4   : > { %5655 = vmatpush3.bf16.msra.mxu1 %v6431_v23  ;;  %4571 = vmatprep.subr.bf16.mxu0 %v6434_v24  ;;  %v6496_v23 = vld [vmem:[%s8733_s3 + $0x4b8] ss:$12 sps:$4 sm:$0xff]  }
 0x1c5   : > { %5656 = vmatprep.subr.bf16.mxu1 %v6435_v31  ;;  %v6499_v24 = vld [vmem:[%s8733_s3 + $0x4e4] ss:$12 sps:$4 sm:$0xff]  }
 0x1c6   : > { %v6500_v31 = vld [vmem:[%s8733_s3 + $0x590] ss:$12 sps:$4 sm:$0xff]  }
 0x1c7   : > { %4572 = vmatpush1.bf16.msra.mxu0 %v6432_v6  ;;  %v6497_v6 = vld [vmem:[%s8733_s3 + $0x4e0] ss:$12 sps:$4 sm:$0xff]  }
 0x1c8   : > { %5657 = vmatpush3.bf16.msra.mxu1 %v6436_v27  ;;  %4573 = vmatprep.subr.bf16.mxu0 %v6439_v28  ;;  %v6501_v27 = vld [vmem:[%s8733_s3 + $0x4d0] ss:$12 sps:$4 sm:$0xff]  }
 0x1c9   : > { %5658 = vmatprep.subr.bf16.mxu1 %v6440_v30  ;;  %v6504_v28 = vld [vmem:[%s8733_s3 + $0x4fc] ss:$12 sps:$4 sm:$0xff]  }
 0x1ca   : > { %v6505_v30 = vld [vmem:[%s8733_s3 + $0x5a8] ss:$12 sps:$4 sm:$0xff]  }
 0x1cb   : > { %4574 = vmatpush1.bf16.msra.mxu0 %v6437_v33  ;;  %v6502_v33 = vld [vmem:[%s8733_s3 + $0x4f8] ss:$12 sps:$4 sm:$0xff]  }
 0x1cc   : > { %5659 = vmatpush3.bf16.msra.mxu1 %v6441_v34  ;;  %4575 = vmatprep.subr.bf16.mxu0 %v6444_v35  ;;  %v552_v34 = vsub.s32 7, %v7693_v45  ;;  %v6506_v35 = vld [vmem:[%s8733_s3 + $0x4e8] ss:$12 sps:$4 sm:$0xff]  }
 0x1cd   : > { %5666 = vmatprep.subr.bf16.mxu1 %v6445_v36  ;;  %v6509_v36 = vld [vmem:[%s8733_s3 + $0x514] ss:$12 sps:$4 sm:$0xff]  }
 0x1cf   : > { %4576 = vmatpush1.bf16.msra.mxu0 %v6442_v37  ;;  %4794 = vmatmul.mubr.bf16.vlgmr.msra.gmra.mrb[20].mxu1 %v8003_v55  ;;  %v6465_v55 = vld [vmem:[%s8733_s3 + $0x428] ss:$12 sps:$4 sm:$0xff]   ;;  %v548_v37 = vsub.s32 6, %v7693_v45  ;;  %v6625_v45 = vld [vmem:[%s8733_s3 + $0x784] ss:$12 sps:$4 sm:$0xff]  }
 0x1d0   : > { %5667 = vmatpush3.bf16.msra.mxu1 %v6446_v38  ;;  %4833 = vmatprep.mubr.bf16.mxu1 %v8011_v59  ;;  %v6466_v59 = vld [vmem:[%s8733_s3 + $0x368] ss:$12 sps:$4 sm:$0xff]   ;;  %v6510_v38 = vld [vmem:[%s8733_s3 + $0x5c0] ss:$12 sps:$4 sm:$0xff]  }
 0x1d1   : > { %4577 = vmatprep.subr.bf16.mxu0 %v6449_v39  ;;  %5668 = vmatprep.subr.bf16.mxu1 %v6450_v40  ;;  %v8285_v39 = vld [vmem:[%s8732_s2 + $0x8] sm:$0xf]  ;;  %v6507_v40 = vld [vmem:[%s8733_s3 + $0x510] ss:$12 sps:$4 sm:$0xff]  }
 0x1d3   : > { %4578 = vmatpush1.bf16.msra.mxu0 %v6447_v41  ;;  %v6671_v41 = vld [vmem:[%s8732_s2] sm:$0xff] }
 0x1d4   : > { %5669 = vmatpush3.bf16.msra.mxu1 %v6451_v42  ;;  %4579 = vmatprep.subr.bf16.mxu0 %v6454_v43  ;;  %v553_v42 = vrot.slane %v6671_v41, %v552_v34  ;;  %v6511_v43 = vld [vmem:[%s8733_s3 + $0x500] ss:$12 sps:$4 sm:$0xff]   ;;  %v557_v34 = vrot.slane %v8285_v39, %v7710_v49 }
 0x1d5   : > { %5670 = vmatprep.subr.bf16.mxu1 %v6455_v44  ;;  %v6514_v44 = vld [vmem:[%s8733_s3 + $0x52c] ss:$12 sps:$4 sm:$0xff]  }
 0x1d7   : > { %4580 = vmatpush1.bf16.msra.mxu0 %v6452_v21  ;;  %v549_v21 = vrot.slane %v6671_v41, %v548_v37  ;;  %v6556_v37 = vld [vmem:[%s8733_s3 + $0x698] ss:$12 sps:$4 sm:$0xff]   ;;  %v6560_v41 = vld [vmem:[%s8733_s3 + $0x770] ss:$12 sps:$4 sm:$0xff]  }
 0x1d8   : > { %5671 = vmatpush3.bf16.msra.mxu1 %v6456_v46  ;;  %4581 = vmatprep.subr.bf16.mxu0 %v6459_v47  ;;  %v6515_v47 = vld [vmem:[%s8733_s3 + $0x5d8] ss:$12 sps:$4 sm:$0xff]  }
 0x1d9   : > { %5672 = vmatprep.subr.bf16.mxu1 %v6460_v51  ;;  %v561_v51 = vrot.slane %v8285_v39, %v7713_v50 }
 0x1db   : > { %4582 = vmatpush1.bf16.msra.mxu0 %v6457_v52 }
 0x1dc   : > { %5673 = vmatpush3.bf16.msra.mxu1 %v6461_v26  ;;  %4583 = vmatprep.subr.bf16.mxu0 %v6464_v54  ;;  %v6512_v54 = vld [vmem:[%s8733_s3 + $0x528] ss:$12 sps:$4 sm:$0xff]  }
 0x1dd   : > { %5674 = vmatprep.subr.bf16.mxu1 %v6465_v55 }
 0x1df   : > { %4584 = vmatpush1.bf16.msra.mxu0 %v6462_v56  ;;  %v6516_v56 = vld [vmem:[%s8733_s3 + $0x518] ss:$12 sps:$4 sm:$0xff]  }
 0x1e0   : > { %5675 = vmatpush3.bf16.msra.mxu1 %v6466_v59  ;;  %4585 = vmatprep.subr.bf16.mxu0 %v6469_v58 }
 0x1e1   : > { %5676 = vmatprep.subr.bf16.mxu1 %v6470_v1  ;;  %v5763_v1 = vadd.f32 %v8060_v11, %v561_v51  ;;  %v6524_v11 = vld [vmem:[%s8733_s3 + $0x55c] ss:$12 sps:$4 sm:$0xff]  }
 0x1e2   : > { %v6587_v51 = vld [vmem:[%s8733_s3 + $0x788] ss:$12 sps:$4 sm:$0xff]  }
 0x1e3   : > { %4586 = vmatpush1.bf16.msra.mxu0 %v6467_v48  ;;  %v6520_v48 = vld [vmem:[%s8733_s3 + $0x5f0] ss:$12 sps:$4 sm:$0xff]   ;;  %v2523_v0 = vmax.f32 %v5763_v1, 0.0 }
 0x1e4   : > { %5677 = vmatpush3.bf16.msra.mxu1 %v6471_v61  ;;  %4587 = vmatprep.subr.bf16.mxu0 %v6474_v62  ;;  %v6517_v61 = vld [vmem:[%s8733_s3 + $0x540] ss:$12 sps:$4 sm:$0xff]   ;;  %v6521_v62 = vld [vmem:[%s8733_s3 + $0x530] ss:$12 sps:$4 sm:$0xff]  }
 0x1e5   : > { %5678 = vmatprep.subr.bf16.mxu1 %v6475_v63  ;;  %v6601_v1 = vld [vmem:[%s8733_s3 + $0x890] ss:$12 sps:$4 sm:$0xff]  }
 0x1e7   : > { %4588 = vmatpush1.bf16.msra.mxu0 %v6472_v25  ;;  %v6525_v25 = vld [vmem:[%s8733_s3 + $0x6c8] ss:$12 sps:$4 sm:$0xff]  }
 0x1e8   : > { %5679 = vmatpush3.bf16.msra.mxu1 %v6476_v2  ;;  %4598 = vmatprep.subr.bf16.mxu0 %v6479_v7  ;;  %v6522_v2 = vld [vmem:[%s8733_s3 + $0x558] ss:$12 sps:$4 sm:$0xff]   ;;  %v6526_v7 = vld [vmem:[%s8733_s3 + $0x608] ss:$12 sps:$4 sm:$0xff]  }
 0x1e9   : > { %5680 = vmatprep.subr.bf16.mxu1 %v6480_v3 }
 0x1ea   : > { %4590 = vmatmul.mubr.bf16.vlgmr.msra.gmra.mrb[8].mxu0 %v2530_v5 }
 0x1eb   : > { %4599 = vmatpush1.bf16.msra.mxu0 %v6477_v4  ;;  %v6529_v4 = vld [vmem:[%s8733_s3 + $0x574] ss:$12 sps:$4 sm:$0xff]  }
 0x1ec   : > { %5681 = vmatpush3.bf16.msra.mxu1 %v6481_v8  ;;  %4600 = vmatprep.subr.bf16.mxu0 %v6484_v10  ;;  %v8343_v8 = vpack.c.bf16 %v2523_v0, %v2523_v0  ;;  %v6527_v10 = vld [vmem:[%s8733_s3 + $0x570] ss:$12 sps:$4 sm:$0xff]   ;;  %v6611_v0 = vld [vmem:[%s8733_s3 + $0x8c0] ss:$12 sps:$4 sm:$0xff]  }
 0x1ed   : > { %5688 = vmatprep.subr.bf16.mxu1 %v6485_v12  ;;  %v6531_v12 = vld [vmem:[%s8733_s3 + $0x620] ss:$12 sps:$4 sm:$0xff]  }
 0x1ef   : > { %4601 = vmatpush1.bf16.msra.mxu0 %v6482_v13  ;;  %4834 = vmatmul.mubr.bf16.vlgmr.msra.gmra.mrb[24].mxu1 %v2530_v5  ;;  %v6530_v5 = vld [vmem:[%s8733_s3 + $0x6e0] ss:$12 sps:$4 sm:$0xff]  }
 0x1f0   : > { %5689 = vmatpush3.bf16.msra.mxu1 %v6486_v14  ;;  %4602 = vmatprep.subr.bf16.mxu0 %v6489_v15  ;;  %v6534_v13 = vld [vmem:[%s8733_s3 + $0x58c] ss:$12 sps:$4 sm:$0xff]   ;;  %v6532_v15 = vld [vmem:[%s8733_s3 + $0x588] ss:$12 sps:$4 sm:$0xff]  }
 0x1f1   : > { %5690 = vmatprep.subr.bf16.mxu1 %v6490_v16  ;;  %v6535_v14 = vld [vmem:[%s8733_s3 + $0x6f8] ss:$12 sps:$4 sm:$0xff]  }
 0x1f2   : > { %v6536_v16 = vld [vmem:[%s8733_s3 + $0x638] ss:$12 sps:$4 sm:$0xff]  }
 0x1f3   : > { %4603 = vmatpush1.bf16.msra.mxu0 %v6487_v17  ;;  %v6539_v17 = vld [vmem:[%s8733_s3 + $0x5a4] ss:$12 sps:$4 sm:$0xff]  }
 0x1f4   : > { %5691 = vmatpush3.bf16.msra.mxu1 %v6491_v18  ;;  %4604 = vmatprep.subr.bf16.mxu0 %v6494_v19  ;;  %v6540_v18 = vld [vmem:[%s8733_s3 + $0x710] ss:$12 sps:$4 sm:$0xff]   ;;  %v6537_v19 = vld [vmem:[%s8733_s3 + $0x5a0] ss:$12 sps:$4 sm:$0xff]  }
 0x1f5   : > { %5692 = vmatprep.subr.bf16.mxu1 %v6495_v20  ;;  %v6541_v20 = vld [vmem:[%s8733_s3 + $0x650] ss:$12 sps:$4 sm:$0xff]  }
 0x1f7   : > { %4605 = vmatpush1.bf16.msra.mxu0 %v6492_v22  ;;  %v6544_v22 = vld [vmem:[%s8733_s3 + $0x5bc] ss:$12 sps:$4 sm:$0xff]  }
 0x1f8   : > { %5693 = vmatpush3.bf16.msra.mxu1 %v6496_v23  ;;  %4606 = vmatprep.subr.bf16.mxu0 %v6499_v24  ;;  %v6545_v23 = vld [vmem:[%s8733_s3 + $0x728] ss:$12 sps:$4 sm:$0xff]   ;;  %v6542_v24 = vld [vmem:[%s8733_s3 + $0x5b8] ss:$12 sps:$4 sm:$0xff]  }
 0x1f9   : > { %5694 = vmatprep.subr.bf16.mxu1 %v6500_v31  ;;  %v6546_v31 = vld [vmem:[%s8733_s3 + $0x668] ss:$12 sps:$4 sm:$0xff]  }
 0x1fb   : > { %4607 = vmatpush1.bf16.msra.mxu0 %v6497_v6  ;;  %v6549_v6 = vld [vmem:[%s8733_s3 + $0x5d4] ss:$12 sps:$4 sm:$0xff]  }
 0x1fc   : > { %5695 = vmatpush3.bf16.msra.mxu1 %v6501_v27  ;;  %4608 = vmatprep.subr.bf16.mxu0 %v6504_v28  ;;  %v6550_v27 = vld [vmem:[%s8733_s3 + $0x740] ss:$12 sps:$4 sm:$0xff]   ;;  %v6547_v28 = vld [vmem:[%s8733_s3 + $0x5d0] ss:$12 sps:$4 sm:$0xff]  }
 0x1fd   : > { %5696 = vmatprep.subr.bf16.mxu1 %v6505_v30  ;;  %v6551_v30 = vld [vmem:[%s8733_s3 + $0x680] ss:$12 sps:$4 sm:$0xff]  }
 0x1ff   : > { %4609 = vmatpush1.bf16.msra.mxu0 %v6502_v33  ;;  %v6554_v33 = vld [vmem:[%s8733_s3 + $0x5ec] ss:$12 sps:$4 sm:$0xff]  }
 0x200   : > { %5697 = vmatpush3.bf16.msra.mxu1 %v6506_v35  ;;  %4610 = vmatprep.subr.bf16.mxu0 %v6509_v36  ;;  %v6555_v35 = vld [vmem:[%s8733_s3 + $0x758] ss:$12 sps:$4 sm:$0xff]   ;;  %v6552_v36 = vld [vmem:[%s8733_s3 + $0x5e8] ss:$12 sps:$4 sm:$0xff]  }
 0x201   : > { %v2343_v46 = vpop.f32.mrb[8].mxu1  ;;  %5698 = vmatprep.subr.bf16.mxu1 %v6510_v38  ;;  %v6559_v38 = vld [vmem:[%s8733_s3 + $0x604] ss:$12 sps:$4 sm:$0xff]  }
 0x202   : > { %v2345_v52 = vpop.f32.mrb[9].mxu1  ;;  %v5760_v59 = vadd.f32 %v2343_v46, %v549_v21  ;;  %v6586_v21 = vld [vmem:[%s8733_s3 + $0x848] ss:$12 sps:$4 sm:$0xff]   ;;  %v6562_v46 = vld [vmem:[%s8733_s3 + $0x618] ss:$12 sps:$4 sm:$0xff]  }
 0x203   : > { %v5761_v53 = vadd.f32 %v2345_v52, %v553_v42  ;;  %4611 = vmatpush1.bf16.msra.mxu0 %v6507_v40  ;;  %v2347_v26 = vpop.f32.mrb[10].mxu1  ;;  %v5762_v40 = vadd.f32 %v8055_v9, %v557_v34  ;;  %v6557_v42 = vld [vmem:[%s8733_s3 + $0x600] ss:$12 sps:$4 sm:$0xff]   ;;  %v6564_v9 = vld [vmem:[%s8733_s3 + $0x61c] ss:$12 sps:$4 sm:$0xff]  }
 0x204   : > { %5699 = vmatpush3.bf16.msra.mxu1 %v6511_v43  ;;  %v2348_v55 = vpop.f32.mrb[11].mxu1  ;;  %4612 = vmatprep.subr.bf16.mxu0 %v6514_v44  ;;  %v2520_v63 = vmax.f32 %v5760_v59, 0.0  ;;  %v6561_v43 = vld [vmem:[%s8733_s3 + $0x6b0] ss:$12 sps:$4 sm:$0xff]  }
 0x205   : > { %v2521_v58 = vmax.f32 %v5761_v53, 0.0  ;;  %5700 = vmatprep.subr.bf16.mxu1 %v6515_v47  ;;  %v2522_v44 = vmax.f32 %v5762_v40, 0.0  ;;  %v6567_v47 = vld [vmem:[%s8733_s3 + $0x634] ss:$12 sps:$4 sm:$0xff]   ;;  %v6565_v26 = vld [vmem:[%s8733_s3 + $0x630] ss:$12 sps:$4 sm:$0xff]  }
 0x206   : > { %v8335_v3 = vpack.c.bf16 %v2520_v63, %v2520_v63  ;;  %v6591_v53 = vld [vmem:[%s8733_s3 + $0x860] ss:$12 sps:$4 sm:$0xff]   ;;  %v6573_v59 = vld [vmem:[%s8733_s3 + $0x664] ss:$12 sps:$4 sm:$0xff]  }
 0x207   : > { %v2533_v60 = vpack.c.bf16 %v2521_v58, %v2521_v58  ;;  %4613 = vmatpush1.bf16.msra.mxu0 %v6512_v54  ;;  %v8445_v52 = vpack.c.bf16 %v2522_v44, %v2522_v44  ;;  %v6570_v54 = vld [vmem:[%s8733_s3 + $0x64c] ss:$12 sps:$4 sm:$0xff]   ;;  %v6579_v63 = vld [vmem:[%s8733_s3 + $0x694] ss:$12 sps:$4 sm:$0xff]   ;;  %v6628_v44 = vld [vmem:[%s8733_s3 + $0x79c] ss:$12 sps:$4 sm:$0xff]  }
 0x208   : > { %5701 = vmatpush3.bf16.msra.mxu1 %v6516_v56  ;;  %4614 = vmatprep.subr.bf16.mxu0 %v6519_v57  ;;  %v6592_v55 = vld [vmem:[%s8733_s3 + $0x7a0] ss:$12 sps:$4 sm:$0xff]   ;;  %v6596_v56 = vld [vmem:[%s8733_s3 + $0x878] ss:$12 sps:$4 sm:$0xff]   ;;  %v6568_v57 = vld [vmem:[%s8733_s3 + $0x648] ss:$12 sps:$4 sm:$0xff]  }
 0x209   : > { %4630 = vmatprep.mubr.bf16.mxu0 %v2533_v60  ;;  %4873 = vmatprep.mubr.bf16.mxu1 %v2533_v60  ;;  %v6597_v58 = vld [vmem:[%s8733_s3 + $0x7b8] ss:$12 sps:$4 sm:$0xff]   ;;  %v6576_v60 = vld [vmem:[%s8733_s3 + $0x67c] ss:$12 sps:$4 sm:$0xff]  }
 0x20a   : > { %5702 = vmatprep.subr.bf16.mxu1 %v6520_v48  ;;  %v6571_v48 = vld [vmem:[%s8733_s3 + $0x660] ss:$12 sps:$4 sm:$0xff]  }
 0x20b   : > { %4615 = vmatpush1.bf16.msra.mxu0 %v6517_v61  ;;  %v6602_v61 = vld [vmem:[%s8733_s3 + $0x7d0] ss:$12 sps:$4 sm:$0xff]  }
 0x20c   : > { %5703 = vmatpush3.bf16.msra.mxu1 %v6521_v62  ;;  %4616 = vmatprep.subr.bf16.mxu0 %v6524_v11  ;;  %v6606_v62 = vld [vmem:[%s8733_s3 + $0x8a8] ss:$12 sps:$4 sm:$0xff]   ;;  %v6574_v11 = vld [vmem:[%s8733_s3 + $0x678] ss:$12 sps:$4 sm:$0xff]  }
 0x20d   : > { %5710 = vmatprep.subr.bf16.mxu1 %v6525_v25  ;;  %v6607_v25 = vld [vmem:[%s8733_s3 + $0x7e8] ss:$12 sps:$4 sm:$0xff]  }
 0x20f   : > { %4617 = vmatpush1.bf16.msra.mxu0 %v6522_v2  ;;  %4874 = vmatmul.mubr.bf16.vlgmr.msra.gmra.mrb[28].mxu1 %v8335_v3  ;;  %v6577_v2 = vld [vmem:[%s8733_s3 + $0x690] ss:$12 sps:$4 sm:$0xff]  }
 0x210   : > { %5711 = vmatpush3.bf16.msra.mxu1 %v6526_v7  ;;  %4913 = vmatprep.mubr.bf16.mxu1 %v8343_v8  ;;  %v6582_v7 = vld [vmem:[%s8733_s3 + $0x6ac] ss:$12 sps:$4 sm:$0xff]  }
 0x211   : > { %4618 = vmatprep.subr.bf16.mxu0 %v6529_v4  ;;  %5712 = vmatprep.subr.bf16.mxu1 %v6530_v5  ;;  %v6616_v4 = vld [vmem:[%s8733_s3 + $0x8d8] ss:$12 sps:$4 sm:$0xff]   ;;  %v6580_v5 = vld [vmem:[%s8733_s3 + $0x6a8] ss:$12 sps:$4 sm:$0xff]  }
 0x213   : > { %4619 = vmatpush1.bf16.msra.mxu0 %v6527_v10  ;;  %v6617_v10 = vld [vmem:[%s8733_s3 + $0x818] ss:$12 sps:$4 sm:$0xff]  }
 0x214   : > { %5713 = vmatpush3.bf16.msra.mxu1 %v6531_v12  ;;  %4620 = vmatprep.subr.bf16.mxu0 %v6534_v13  ;;  %v6621_v12 = vld [vmem:[%s8733_s3 + $0x8f0] ss:$12 sps:$4 sm:$0xff]   ;;  %v6583_v13 = vld [vmem:[%s8733_s3 + $0x6c0] ss:$12 sps:$4 sm:$0xff]  }
 0x215   : > { %5714 = vmatprep.subr.bf16.mxu1 %v6535_v14  ;;  %v6590_v14 = vld [vmem:[%s8733_s3 + $0x6dc] ss:$12 sps:$4 sm:$0xff]  }
 0x217   : > { %4621 = vmatpush1.bf16.msra.mxu0 %v6532_v15  ;;  %v6622_v15 = vld [vmem:[%s8733_s3 + $0x830] ss:$12 sps:$4 sm:$0xff]  }
 0x218   : > { %5715 = vmatpush3.bf16.msra.mxu1 %v6536_v16  ;;  %4622 = vmatprep.subr.bf16.mxu0 %v6539_v17  ;;  %v6588_v16 = vld [vmem:[%s8733_s3 + $0x6d8] ss:$12 sps:$4 sm:$0xff]   ;;  %v6595_v17 = vld [vmem:[%s8733_s3 + $0x6f4] ss:$12 sps:$4 sm:$0xff]  }
 0x219   : > { %5716 = vmatprep.subr.bf16.mxu1 %v6540_v18  ;;  %v6593_v18 = vld [vmem:[%s8733_s3 + $0x6f0] ss:$12 sps:$4 sm:$0xff]  }
 0x21b   : > { %4623 = vmatpush1.bf16.msra.mxu0 %v6537_v19  ;;  %v6600_v19 = vld [vmem:[%s8733_s3 + $0x70c] ss:$12 sps:$4 sm:$0xff]  }
 0x21c   : > { %5717 = vmatpush3.bf16.msra.mxu1 %v6541_v20  ;;  %4624 = vmatprep.subr.bf16.mxu0 %v6544_v22  ;;  %v6598_v20 = vld [vmem:[%s8733_s3 + $0x708] ss:$12 sps:$4 sm:$0xff]   ;;  %v6605_v22 = vld [vmem:[%s8733_s3 + $0x724] ss:$12 sps:$4 sm:$0xff]  }
 0x21d   : > { %5718 = vmatprep.subr.bf16.mxu1 %v6545_v23  ;;  %v6603_v23 = vld [vmem:[%s8733_s3 + $0x720] ss:$12 sps:$4 sm:$0xff]  }
 0x21f   : > { %4625 = vmatpush1.bf16.msra.mxu0 %v6542_v24  ;;  %v6610_v24 = vld [vmem:[%s8733_s3 + $0x73c] ss:$12 sps:$4 sm:$0xff]  }
 0x220   : > { %5719 = vmatpush3.bf16.msra.mxu1 %v6546_v31  ;;  %4626 = vmatprep.subr.bf16.mxu0 %v6549_v6  ;;  %v6608_v31 = vld [vmem:[%s8733_s3 + $0x738] ss:$12 sps:$4 sm:$0xff]   ;;  %v6615_v6 = vld [vmem:[%s8733_s3 + $0x754] ss:$12 sps:$4 sm:$0xff]  }
 0x221   : > { %5720 = vmatprep.subr.bf16.mxu1 %v6550_v27  ;;  %v565_v27 = vrot.slane %v8285_v39, %v7972_v29 }
 0x223   : > { %4627 = vmatpush1.bf16.msra.mxu0 %v6547_v28  ;;  %v6613_v28 = vld [vmem:[%s8733_s3 + $0x750] ss:$12 sps:$4 sm:$0xff]  }
 0x224   : > { %5721 = vmatpush3.bf16.msra.mxu1 %v6551_v30  ;;  %4628 = vmatprep.subr.bf16.mxu0 %v6554_v33  ;;  %v569_v30 = vrot.slane %v8285_v39, %v536_v32  ;;  %v6620_v33 = vld [vmem:[%s8733_s3 + $0x76c] ss:$12 sps:$4 sm:$0xff]  }
 0x225   : > { %5722 = vmatprep.subr.bf16.mxu1 %v6555_v35 }
 0x227   : > { %4629 = vmatpush1.bf16.msra.mxu0 %v6552_v36 }
 0x228   : > { %5723 = vmatpush3.bf16.msra.mxu1 %v6556_v37  ;;  %4639 = vmatprep.subr.bf16.mxu0 %v6559_v38  ;;  %v6618_v38 = vld [vmem:[%s8733_s3 + $0x768] ss:$12 sps:$4 sm:$0xff]  }
 0x229   : > { %5724 = vmatprep.subr.bf16.mxu1 %v6560_v41 }
 0x22a   : > { %4631 = vmatmul.mubr.bf16.vlgmr.msra.gmra.mrb[8].mxu0 %v8335_v3  ;;  %v6612_v3 = vld [vmem:[%s8733_s3 + $0x800] ss:$12 sps:$4 sm:$0xff]  }
 0x22b   : > { %4640 = vmatpush1.bf16.msra.mxu0 %v6557_v42  ;;  %4671 = vmatprep.mubr.bf16.mxu0 %v8343_v8  ;;  %v6585_v8 = vld [vmem:[%s8733_s3 + $0x6c4] ss:$12 sps:$4 sm:$0xff]  }
 0x22c   : > { %5725 = vmatpush3.bf16.msra.mxu1 %v6561_v43  ;;  %4641 = vmatprep.subr.bf16.mxu0 %v6564_v9  ;;  %v6623_v9 = vld [vmem:[%s8733_s3 + $0x780] ss:$12 sps:$4 sm:$0xff]  }
 0x22d   : > { %5732 = vmatprep.subr.bf16.mxu1 %v6586_v21  ;;  %v6626_v21 = vld [vmem:[%s8733_s3 + $0x798] ss:$12 sps:$4 sm:$0xff]  }
 0x22f   : > { %4642 = vmatpush1.bf16.msra.mxu0 %v6562_v46  ;;  %4914 = vmatmul.mubr.bf16.vlgmr.msra.gmra.mrb[32].mxu1 %v8445_v52  ;;  %v6631_v46 = vld [vmem:[%s8733_s3 + $0x7b4] ss:$12 sps:$4 sm:$0xff]  }
 0x230   : > { %4643 = vmatprep.subr.bf16.mxu0 %v6567_v47  ;;  %5733 = vmatpush3.bf16.msra.mxu1 %v6587_v51  ;;  %v6629_v47 = vld [vmem:[%s8733_s3 + $0x7b0] ss:$12 sps:$4 sm:$0xff]   ;;  %v6634_v51 = vld [vmem:[%s8733_s3 + $0x7cc] ss:$12 sps:$4 sm:$0xff]  }
 0x231   : > { %5734 = vmatprep.subr.bf16.mxu1 %v6591_v53  ;;  %v6637_v53 = vld [vmem:[%s8733_s3 + $0x7e4] ss:$12 sps:$4 sm:$0xff]  }
 0x233   : > { %4644 = vmatpush1.bf16.msra.mxu0 %v6565_v26  ;;  %v6635_v26 = vld [vmem:[%s8733_s3 + $0x7e0] ss:$12 sps:$4 sm:$0xff]  }
 0x234   : > { %4645 = vmatprep.subr.bf16.mxu0 %v6570_v54  ;;  %5735 = vmatpush3.bf16.msra.mxu1 %v6592_v55  ;;  %v6640_v54 = vld [vmem:[%s8733_s3 + $0x7fc] ss:$12 sps:$4 sm:$0xff]   ;;  %v6638_v55 = vld [vmem:[%s8733_s3 + $0x7f8] ss:$12 sps:$4 sm:$0xff]  }
 0x235   : > { %5736 = vmatprep.subr.bf16.mxu1 %v6596_v56  ;;  %v6643_v56 = vld [vmem:[%s8733_s3 + $0x814] ss:$12 sps:$4 sm:$0xff]  }
 0x237   : > { %4646 = vmatpush1.bf16.msra.mxu0 %v6568_v57  ;;  %v6641_v57 = vld [vmem:[%s8733_s3 + $0x810] ss:$12 sps:$4 sm:$0xff]  }
 0x238   : > { %4647 = vmatprep.subr.bf16.mxu0 %v6573_v59  ;;  %5737 = vmatpush3.bf16.msra.mxu1 %v6597_v58  ;;  %v6646_v59 = vld [vmem:[%s8733_s3 + $0x82c] ss:$12 sps:$4 sm:$0xff]  }
 0x239   : > { %5738 = vmatprep.subr.bf16.mxu1 %v6601_v1 }
 0x23b   : > { %4648 = vmatpush1.bf16.msra.mxu0 %v6571_v48  ;;  %v6644_v48 = vld [vmem:[%s8733_s3 + $0x828] ss:$12 sps:$4 sm:$0xff]  }
 0x23c   : > { %4649 = vmatprep.subr.bf16.mxu0 %v6576_v60  ;;  %5739 = vmatpush3.bf16.msra.mxu1 %v6602_v61 }
 0x23d   : > { %5740 = vmatprep.subr.bf16.mxu1 %v6606_v62  ;;  %v6649_v62 = vld [vmem:[%s8733_s3 + $0x844] ss:$12 sps:$4 sm:$0xff]  }
 0x23f   : > { %4650 = vmatpush1.bf16.msra.mxu0 %v6574_v11 }
 0x240   : > { %4651 = vmatprep.subr.bf16.mxu0 %v6579_v63  ;;  %5741 = vmatpush3.bf16.msra.mxu1 %v6607_v25  ;;  %v6647_v63 = vld [vmem:[%s8733_s3 + $0x840] ss:$12 sps:$4 sm:$0xff]   ;;  %v6652_v25 = vld [vmem:[%s8733_s3 + $0x85c] ss:$12 sps:$4 sm:$0xff]  }
 0x241   : > { %5742 = vmatprep.subr.bf16.mxu1 %v6611_v0  ;;  %v6650_v0 = vld [vmem:[%s8733_s3 + $0x858] ss:$12 sps:$4 sm:$0xff]  }
 0x243   : > { %4652 = vmatpush1.bf16.msra.mxu0 %v6577_v2  ;;  %v6655_v2 = vld [vmem:[%s8733_s3 + $0x874] ss:$12 sps:$4 sm:$0xff]  }
 0x244   : > { %4653 = vmatprep.subr.bf16.mxu0 %v6582_v7  ;;  %5743 = vmatpush3.bf16.msra.mxu1 %v6612_v3  ;;  %v6653_v7 = vld [vmem:[%s8733_s3 + $0x870] ss:$12 sps:$4 sm:$0xff]   ;;  %v6658_v3 = vld [vmem:[%s8733_s3 + $0x88c] ss:$12 sps:$4 sm:$0xff]  }
 0x245   : > { %5744 = vmatprep.subr.bf16.mxu1 %v6616_v4  ;;  %v6656_v4 = vld [vmem:[%s8733_s3 + $0x888] ss:$12 sps:$4 sm:$0xff]  }
 0x247   : > { %4654 = vmatpush1.bf16.msra.mxu0 %v6580_v5  ;;  %v6661_v5 = vld [vmem:[%s8733_s3 + $0x8a4] ss:$12 sps:$4 sm:$0xff]  }
 0x248   : > { %4655 = vmatprep.subr.bf16.mxu0 %v6585_v8  ;;  %5745 = vmatpush3.bf16.msra.mxu1 %v6617_v10  ;;  %v6659_v8 = vld [vmem:[%s8733_s3 + $0x8a0] ss:$12 sps:$4 sm:$0xff]   ;;  %v6664_v10 = vld [vmem:[%s8733_s3 + $0x8bc] ss:$12 sps:$4 sm:$0xff]  }
 0x249   : > { %5746 = vmatprep.subr.bf16.mxu1 %v6621_v12  ;;  %v6662_v12 = vld [vmem:[%s8733_s3 + $0x8b8] ss:$12 sps:$4 sm:$0xff]  }
 0x24b   : > { %4656 = vmatpush1.bf16.msra.mxu0 %v6583_v13  ;;  %v6667_v13 = vld [vmem:[%s8733_s3 + $0x8d4] ss:$12 sps:$4 sm:$0xff]  }
 0x24c   : > { %4657 = vmatprep.subr.bf16.mxu0 %v6590_v14  ;;  %5747 = vmatpush3.bf16.msra.mxu1 %v6622_v15  ;;  %v2922_v14 = vld [vmem:[%s8734_s4] sm:$0x7]  ;;  %v6665_v15 = vld [vmem:[%s8733_s3 + $0x8d0] ss:$12 sps:$4 sm:$0xff]  }
 0x24f   : > { %4658 = vmatpush1.bf16.msra.mxu0 %v6588_v16  ;;  %v2935_v16 = vrot.slane %v2922_v14, %v7972_v29 }
 0x250   : > { %4659 = vmatprep.subr.bf16.mxu0 %v6595_v17  ;;  %v6670_v17 = vld [vmem:[%s8733_s3 + $0x8ec] ss:$12 sps:$4 sm:$0xff]  }
 0x253   : > { %4660 = vmatpush1.bf16.msra.mxu0 %v6593_v18 }
 0x254   : > { %4661 = vmatprep.subr.bf16.mxu0 %v6600_v19 }
 0x257   : > { %4662 = vmatpush1.bf16.msra.mxu0 %v6598_v20  ;;  %v6668_v20 = vld [vmem:[%s8733_s3 + $0x8e8] ss:$12 sps:$4 sm:$0xff]  }
 0x258   : > { %4663 = vmatprep.subr.bf16.mxu0 %v6605_v22 }
 0x25b   : > { %4664 = vmatpush1.bf16.msra.mxu0 %v6603_v23 }
 0x25c   : > { %4665 = vmatprep.subr.bf16.mxu0 %v6610_v24 }
 0x25f   : > { %4666 = vmatpush1.bf16.msra.mxu0 %v6608_v31 }
 0x260   : > { %4667 = vmatprep.subr.bf16.mxu0 %v6615_v6 }
 0x261   : > { %v2507_v34 = vpop.f32.mrb[12].mxu1 }
 0x262   : > { %v5764_v35 = vadd.f32 %v2507_v34, %v565_v27  ;;  %v2509_v36 = vpop.f32.mrb[13].mxu1 }
 0x263   : > { %v5765_v37 = vadd.f32 %v2509_v36, %v569_v30  ;;  %4668 = vmatpush1.bf16.msra.mxu0 %v6613_v28  ;;  %v2511_v40 = vpop.f32.mrb[14].mxu1 }
 0x264   : > { %v2524_v41 = vmax.f32 %v5764_v35, 0.0  ;;  %4669 = vmatprep.subr.bf16.mxu0 %v6620_v33  ;;  %v2512_v32 = vpop.f32.mrb[15].mxu1 }
 0x265   : > { %v2525_v39 = vmax.f32 %v5765_v37, 0.0 }
 0x266   : > { %v8579_v42 = vpack.c.bf16 %v2524_v41, %v2524_v41 }
 0x267   : > { %v2537_v43 = vpack.c.bf16 %v2525_v39, %v2525_v39  ;;  %4670 = vmatpush1.bf16.msra.mxu0 %v6618_v38 }
 0x268   : > { %4680 = vmatprep.subr.bf16.mxu0 %v6625_v45 }
 0x269   : > { %4953 = vmatprep.mubr.bf16.mxu1 %v2537_v43 }
 0x26a   : > { %4672 = vmatmul.mubr.bf16.vlgmr.msra.gmra.mrb[8].mxu0 %v8445_v52  ;;  %4954 = vmatmul.mubr.bf16.vlgmr.msra.gmra.mrb[36].mxu1 %v8579_v42  ;;  %v6632_v52 = vld [vmem:[%s8733_s3 + $0x7c8] ss:$12 sps:$4 sm:$0xff]  }
 0x26b   : > { %4681 = vmatpush1.bf16.msra.mxu0 %v6623_v9  ;;  %4712 = vmatprep.mubr.bf16.mxu0 %v2537_v43 }
 0x26c   : > { %4682 = vmatprep.subr.bf16.mxu0 %v6628_v44 }
 0x26f   : > { %4683 = vmatpush1.bf16.msra.mxu0 %v6626_v21 }
 0x270   : > { %4684 = vmatprep.subr.bf16.mxu0 %v6631_v46 }
 0x273   : > { %4685 = vmatpush1.bf16.msra.mxu0 %v6629_v47 }
 0x274   : > { %4686 = vmatprep.subr.bf16.mxu0 %v6634_v51 }
 0x277   : > { %4687 = vmatpush1.bf16.msra.mxu0 %v6632_v52 }
 0x278   : > { %4688 = vmatprep.subr.bf16.mxu0 %v6637_v53  ;;  %v2927_v53 = vrot.slane %v2922_v14, %v7710_v49 }
 0x27b   : > { %4689 = vmatpush1.bf16.msra.mxu0 %v6635_v26  ;;  %v2931_v26 = vrot.slane %v2922_v14, %v7713_v50 }
 0x27c   : > { %4690 = vmatprep.subr.bf16.mxu0 %v6640_v54 }
 0x27f   : > { %4691 = vmatpush1.bf16.msra.mxu0 %v6638_v55 }
 0x280   : > { %4692 = vmatprep.subr.bf16.mxu0 %v6643_v56 }
 0x282   : > { %v5638_v58 = vpop.f32.mrb[16].mxu1 }
 0x283   : > { %4693 = vmatpush1.bf16.msra.mxu0 %v6641_v57  ;;  %v5639_v1 = vpop.f32.mrb[17].mxu1 }
 0x284   : > { %v5640_v60 = vadd.f32 %v5639_v1, %v5638_v58  ;;  %v5641_v61 = vpop.f32.mrb[18].mxu1  ;;  %4694 = vmatprep.subr.bf16.mxu0 %v6646_v59 }
 0x285   : > { %v5642_v11 = vpop.f32.mrb[19].mxu1 }
 0x286   : > { %v4756_v22 = vadd.f32 %v5640_v60, %v2935_v16 }
 0x287   : > { %4695 = vmatpush1.bf16.msra.mxu0 %v6644_v48 }
 0x288   : > { %4696 = vmatprep.subr.bf16.mxu0 %v6649_v62 }
 0x28b   : > { %4697 = vmatpush1.bf16.msra.mxu0 %v6647_v63 }
 0x28c   : > { %4698 = vmatprep.subr.bf16.mxu0 %v6652_v25 }
 0x28f   : > { %4699 = vmatpush1.bf16.msra.mxu0 %v6650_v0 }
 0x290   : > { %4700 = vmatprep.subr.bf16.mxu0 %v6655_v2 }
 0x293   : > { %4701 = vmatpush1.bf16.msra.mxu0 %v6653_v7 }
 0x294   : > { %4702 = vmatprep.subr.bf16.mxu0 %v6658_v3 }
 0x297   : > { %4703 = vmatpush1.bf16.msra.mxu0 %v6656_v4 }
 0x298   : > { %4704 = vmatprep.subr.bf16.mxu0 %v6661_v5 }
 0x29b   : > { %4705 = vmatpush1.bf16.msra.mxu0 %v6659_v8 }
 0x29c   : > { %4706 = vmatprep.subr.bf16.mxu0 %v6664_v10 }
 0x29f   : > { %4707 = vmatpush1.bf16.msra.mxu0 %v6662_v12 }
 0x2a0   : > { %4708 = vmatprep.subr.bf16.mxu0 %v6667_v13 }
 0x2a2   : > { %v5660_v18 = vpop.f32.mrb[20].mxu1 }
 0x2a3   : > { %4709 = vmatpush1.bf16.msra.mxu0 %v6665_v15  ;;  %v5661_v19 = vpop.f32.mrb[21].mxu1 }
 0x2a4   : > { %v5662_v23 = vadd.f32 %v5661_v19, %v5660_v18  ;;  %v5663_v24 = vpop.f32.mrb[22].mxu1  ;;  %4710 = vmatprep.subr.bf16.mxu0 %v6670_v17 }
 0x2a5   : > { %v5664_v31 = vpop.f32.mrb[23].mxu1 }
 0x2a6   : > { %v4796_v6 = vadd.f32 %v5662_v23, %v4756_v22 }
 0x2a7   : > { %4711 = vmatpush1.bf16.msra.mxu0 %v6668_v20 }
 0x2aa   : > { %4713 = vmatmul.mubr.bf16.vlgmr.msra.gmra.mrb[8].mxu0 %v8579_v42 }
 0x2c2   : > { %v5682_v29 = vpop.f32.mrb[24].mxu1 }
 0x2c3   : > { %v5683_v27 = vpop.f32.mrb[25].mxu1 }
 0x2c4   : > { %v5684_v28 = vadd.f32 %v5683_v27, %v5682_v29  ;;  %v5685_v30 = vpop.f32.mrb[26].mxu1 }
 0x2c5   : > { %v5686_v33 = vpop.f32.mrb[27].mxu1 }
 0x2c6   : > { %v4836_v34 = vadd.f32 %v5684_v28, %v4796_v6 }
 0x2e2   : > { %v5704_v35 = vpop.f32.mrb[28].mxu1 }
 0x2e3   : > { %v5705_v36 = vpop.f32.mrb[29].mxu1 }
 0x2e4   : > { %v5706_v37 = vadd.f32 %v5705_v36, %v5704_v35  ;;  %v5707_v38 = vpop.f32.mrb[30].mxu1 }
 0x2e5   : > { %v5708_v40 = vpop.f32.mrb[31].mxu1 }
 0x2e6   : > { %v4876_v41 = vadd.f32 %v5706_v37, %v4836_v34 }
 0x302   : > { %v5726_v45 = vpop.f32.mrb[32].mxu1 }
 0x303   : > { %v5727_v32 = vpop.f32.mrb[33].mxu1 }
 0x304   : > { %v5728_v39 = vadd.f32 %v5727_v32, %v5726_v45  ;;  %v5729_v43 = vpop.f32.mrb[34].mxu1 }
 0x305   : > { %v5730_v9 = vpop.f32.mrb[35].mxu1 }
 0x306   : > { %v4916_v42 = vadd.f32 %v5728_v39, %v4876_v41 }
 0x33d   : > { %v5748_v44 = vpop.f32.mrb[36].mxu1 }
 0x33e   : > { %v5749_v21 = vpop.f32.mrb[37].mxu1 }
 0x33f   : > { %v5750_v46 = vadd.f32 %v5749_v21, %v5748_v44  ;;  %v5751_v47 = vpop.f32.mrb[38].mxu1 }
 0x340   : > { %v5752_v51 = vpop.f32.mrb[39].mxu1 }
 0x341   : > { %v4956_v52 = vadd.f32 %v5750_v46, %v4916_v42 }
 0x343   : > { %4963 = vst [vmem:[%s217_s14 + $0x10] sm:$0xff] %v4956_v52 }
 0x37d   : > { %v4714_v54 = vpop.f32.mrb[8].mxu0 }
 0x37e   : > { %v5766_v55 = vadd.f32 %v4714_v54, %v2927_v53  ;;  %v4716_v56 = vpop.f32.mrb[9].mxu0 }
 0x37f   : > { %v5767_v57 = vadd.f32 %v4716_v56, %v2931_v26  ;;  %v4718_v59 = vpop.f32.mrb[10].mxu0 }
 0x380   : > { %4961 = vst [vmem:[%s217_s14] sm:$0xff] %v5766_v55  ;;  %v4719_v49 = vpop.f32.mrb[11].mxu0 }
 0x381   : > { %4962 = vst [vmem:[%s217_s14 + $0x8] sm:$0xff] %v5767_v57 }
 0x382   : > { %6685 = shalt.err (!%p6682_p3)
}
 0x383   : > { %s6686_s6 = scalar_lea.hbm %s8688_s23, 384  ;;  %s6690_s10 = scalar_lea.hbm %s8735_s5, 768 }
 0x384   : > { %p6687_p4 = scmp.ne.s32.totalorder %s8688_s23, %s6686_s6  ;;  %p6691_p9 = scmp.lt.u32.totalorder %s8688_s23, %s8735_s5 }
 0x385   : > { %p6692_p10 = scmp.lt.u32.totalorder %s6690_s10, %s6686_s6  ;;  %p6694_p12 = scmp.lt.u32.totalorder %s6686_s6, %s8688_s23 }
 0x386   : > { %p6688_p7 = pnand %p6687_p4, %p6806_p5 }
 0x387   : > { %p6693_p11 = por %p6692_p10, %p6691_p9 }
 0x388   : > { %p6689_p8 = pneg %p6688_p7 }
 0x389   : > { %p6695_p13 = por %p6694_p12, %p6693_p11 }
 0x38b   : > { %p6696_p0 = pnand %p6695_p13, %p6689_p8 }
 0x38d   : > { %6699 = shalt.err (!%p6696_p0)
}
 0x38e   : > { %5815 = dma.vmem_to_hbm [thread:$0]  (%p6806_p5), %s8690_s16, 384, %s8688_s23, %s4965_s22  }
 0x38f PF: > { %p5821_p1 = scmp.ge.s32.totalorder %s6734_s21, 2  ;;  %s4991_s14 = sand.u32 1, %s6722_s18  }
 0x390   : > { %s4992_s15 = scalar_lea.sflag [#allocation3], %s4991_s14 }
 0x391   : > { %p5818_p2 = pnand %p5821_p1, %p6810_p6 }
 0x393   : > { %6717 = dma.done.wait (!%p5818_p2), %s4992_s15, 384  }
 0x394   : > { %6719 = vsyncadd (!%p5818_p2), %s4992_s15, 4294966912  ;;  %p15_p3 = scmp.ge.s32.totalorder %s6793_s24, 4   ;;  %s8738_s18 = smov %s6726_s19 }
 0x395   : > { %s8739_s19 = smov %s6730_s20  ;;  %s8740_s20 = smov %s6804_s27 }
 0x396   : > { %s8741_s21 = smov %s6793_s24  ;;  %17 = sbr.rel (!%p15_p3) target bundleno = 3 (0x3), region = 75 }
 0x39d   :  { %4997 = vsyncpa [#allocation3], 1 }
 0x39e   :  { %4999 = vsyncpa [#allocation3 + $0x1], 1 }

</bundles_post_ra>
